<compile_context>
chip_gen: v6e
topology: v6e:2x2x1
jax: 0.10.0
libtpu: 0.0.40
codegen_flags: <defaults>
</compile_context>

<pallas_src>
import jax
import jax.numpy as jnp
from jax import lax
from jax.experimental import pallas as pl
from jax.experimental.pallas import tpu as pltpu


def _round_up(v: int, m: int) -> int:
    return ((v + m - 1) // m) * m


_NEG = -1e30  # bias for padded class columns: never wins max / second-largest


# -----------------------------------------------------------------------------
# Single fused kernel: embed+ReLU -> FAConv -> FAConv -> ReLU -> pred ->
# (log_softmax, mean(calib), softmax)
# -----------------------------------------------------------------------------
def _fused_net_kernel(eps_ref, x_ref, adj_ref, we_ref, be_ref,
                      wl_ref, wr_ref, wp_ref, bp_ref,
                      logsm_ref, calib_ref, sm_ref):
    f32 = jnp.float32
    eps = eps_ref[...]                       # (1, 1), broadcasts
    adj = adj_ref[...]                       # (N, N): loaded once, reused twice

    # ---- embed Linear + ReLU (dropout skipped: inference) ----
    x_init = jnp.maximum(
        jnp.dot(x_ref[...], we_ref[...], preferred_element_type=f32)
        + be_ref[...], 0.0)                  # (N, Hp)

    wl = wl_ref[...]                         # (1, Hp)  att_l
    wr = wr_ref[...]                         # (1, Hp)  att_r
    dn = (((1,), (1,)), ((), ()))            # contract last dims of both ops

    def faconv(h):
        # alpha_l (source) as a (1, N) row and alpha_r (target) as an (N, 1)
        # column, both straight off the MXU — no XLU transpose on the alpha
        # critical path.
        al_row = lax.dot_general(wl, h, dn, preferred_element_type=f32)  # (1,N)
        ar_col = lax.dot_general(h, wr, dn, preferred_element_type=f32)  # (N,1)
        alpha = jnp.tanh(ar_col + al_row)                                # (N,N)
        w = (adj * alpha).astype(jnp.bfloat16)       # gcn-norm * attention
        out = jnp.dot(w, h.astype(jnp.bfloat16),     # aggr='add' propagation
                      preferred_element_type=f32)
        return out + eps * x_init

    h = faconv(x_init)       # layer 1 (x = x_init, x_0 = x_init)
    h = faconv(h)            # layer 2 (x = h,      x_0 = x_init)

    # ---- ReLU -> pred Linear -> log_softmax / softmax / calibration ----
    hr = jnp.maximum(h, 0.0)
    logits = jnp.dot(hr, wp_ref[...], preferred_element_type=f32) + bp_ref[...]
    n, cp = logits.shape

    m = jnp.max(logits, axis=-1, keepdims=True)
    e = jnp.exp(logits - m)
    s = jnp.sum(e, axis=-1, keepdims=True)
    sm_ref[...] = e * pl.reciprocal(s, approx=True)
    logsm_ref[...] = logits - m - jnp.log(s)

    # calibration: (second-largest logit - max logit), averaged over rows;
    # only the first occurrence of the max is masked (matches torch.topk).
    col = lax.broadcasted_iota(jnp.int32, (n, cp), 1)
    is_max = logits == m
    first_max_col = jnp.min(jnp.where(is_max, col, cp), axis=-1, keepdims=True)
    masked = jnp.where(col == first_max_col, -jnp.inf, logits)
    second = jnp.max(masked, axis=-1, keepdims=True)
    calib_ref[...] = jnp.sum(second - m, axis=0, keepdims=True) / n


# -----------------------------------------------------------------------------
# Wrapper: pad hidden/class dims to 128 lanes, single pallas_call, slice back.
# -----------------------------------------------------------------------------
def net_forward(x, adj, params, eps=0.1):
    n, _ = x.shape
    hdim = params["w_embed"].shape[1]
    c = params["w_pred"].shape[1]
    hp = _round_up(hdim, 128)
    cp = _round_up(c, 128)

    we = jnp.pad(params["w_embed"], ((0, 0), (0, hp - hdim)))
    be = jnp.pad(params["b_embed"].reshape(1, hdim), ((0, 0), (0, hp - hdim)))
    wl = jnp.pad(params["w_att_l"].reshape(1, hdim), ((0, 0), (0, hp - hdim)))
    wr = jnp.pad(params["w_att_r"].reshape(1, hdim), ((0, 0), (0, hp - hdim)))
    wp = jnp.pad(params["w_pred"], ((0, hp - hdim), (0, cp - c)))
    bp = jnp.pad(params["b_pred"].reshape(1, c), ((0, 0), (0, cp - c)),
                 constant_values=_NEG)
    eps_arr = jnp.full((1, 1), eps, jnp.float32)

    logsm, calib, sm = pl.pallas_call(
        _fused_net_kernel,
        out_shape=(
            jax.ShapeDtypeStruct((n, cp), jnp.float32),   # log_softmax (padded)
            jax.ShapeDtypeStruct((1, 1), jnp.float32),    # mean(calib)
            jax.ShapeDtypeStruct((n, cp), jnp.float32),   # softmax (padded)
        ),
        compiler_params=pltpu.CompilerParams(
            vmem_limit_bytes=32 * 1024 * 1024),
    )(eps_arr, x, adj, we, be, wl, wr, wp, bp)

    return logsm[:, :c], calib, sm[:, :c]


# -----------------------------------------------------------------------------
# Glue: gcn_norm as a dense normalized adjacency (plain JAX, done once)
# -----------------------------------------------------------------------------
def build_norm_adj(edge_index, num_nodes):
    row, col = edge_index[0], edge_index[1]
    a = jnp.zeros((num_nodes, num_nodes), jnp.float32)
    a = a.at[col, row].add(1.0)                     # A[i, j] += 1 for edge j->i
    a = a + jnp.eye(num_nodes, dtype=jnp.float32)   # add self loops (fill=1.0)
    deg = jnp.sum(a, axis=1)                        # scatter_add(|w|, col)
    dinv = jnp.where(deg > 0, 1.0 / jnp.sqrt(deg), 0.0)
    return dinv[:, None] * a * dinv[None, :]


def init_params(key, num_features, hidden, num_classes):
    ks = jax.random.split(key, 6)

    def u(k, shape, fan_in):
        bound = 1.0 / jnp.sqrt(jnp.float32(fan_in))
        return jax.random.uniform(k, shape, jnp.float32, -bound, bound)

    return {
        "w_embed": u(ks[0], (num_features, hidden), num_features),
        "b_embed": u(ks[1], (hidden,), num_features),
        "w_att_l": u(ks[2], (hidden,), hidden),
        "w_att_r": u(ks[3], (hidden,), hidden),
        "w_pred":  u(ks[4], (hidden, num_classes), hidden),
        "b_pred":  u(ks[5], (num_classes,), hidden),
    }


if __name__ == "__main__":
    N, F_IN, HIDDEN, C, E = 128, 16, 64, 8, 512
    key = jax.random.PRNGKey(0)
    k_x, k_src, k_dst, k_p = jax.random.split(key, 4)

    x = jax.random.normal(k_x, (N, F_IN), jnp.float32)
    src = jax.random.randint(k_src, (E,), 0, N)
    dst = jax.random.randint(k_dst, (E,), 0, N)
    dst = jnp.where(dst == src, (dst + 1) % N, dst)   # no explicit self loops
    edge_index = jnp.stack([src, dst], axis=0)

    adj = build_norm_adj(edge_index, N)
    params = init_params(k_p, F_IN, HIDDEN, C)

    log_sm, calib_mean, sm = jax.jit(net_forward)(x, adj, params)
    jax.block_until_ready((log_sm, calib_mean, sm))

    assert log_sm.shape == (N, C) and sm.shape == (N, C) and calib_mean.shape == (1, 1)
    assert bool(jnp.all(jnp.isfinite(log_sm))) and bool(jnp.all(jnp.isfinite(sm)))
    assert bool(jnp.isfinite(calib_mean[0, 0]))
    assert bool(jnp.all(jnp.abs(jnp.sum(sm, axis=-1) - 1.0) < 1e-2))
    print("KERNEL_OK")
</pallas_src>

<mosaic_0001>
module attributes {stable_mosaic.version = 11 : i64} {
  func.func @_fused_net_kernel(%arg0: memref<1x1xf32, #tpu.memory_space<vmem>>, %arg1: memref<128x16xf32, #tpu.memory_space<vmem>>, %arg2: memref<128x128xf32, #tpu.memory_space<vmem>>, %arg3: memref<16x128xf32, #tpu.memory_space<vmem>>, %arg4: memref<1x128xf32, #tpu.memory_space<vmem>>, %arg5: memref<1x128xf32, #tpu.memory_space<vmem>>, %arg6: memref<1x128xf32, #tpu.memory_space<vmem>>, %arg7: memref<128x128xf32, #tpu.memory_space<vmem>>, %arg8: memref<1x128xf32, #tpu.memory_space<vmem>>, %arg9: memref<128x128xf32, #tpu.memory_space<vmem>>, %arg10: memref<1x1xf32, #tpu.memory_space<vmem>>, %arg11: memref<128x128xf32, #tpu.memory_space<vmem>>) attributes {dimension_semantics = [], scalar_prefetch = 0 : i64, scratch_operands = 0 : i64, tpu.core_type = #tpu.core_type<tc>} {
    %c0 = arith.constant 0 : index
    %c0_0 = arith.constant 0 : index
    %0 = vector.load %arg0[%c0, %c0_0] : memref<1x1xf32, #tpu.memory_space<vmem>>, vector<1x1xf32>
    %c0_1 = arith.constant 0 : index
    %c0_2 = arith.constant 0 : index
    %1 = vector.load %arg2[%c0_1, %c0_2] : memref<128x128xf32, #tpu.memory_space<vmem>>, vector<128x128xf32>
    %c0_3 = arith.constant 0 : index
    %c0_4 = arith.constant 0 : index
    %2 = vector.load %arg1[%c0_3, %c0_4] : memref<128x16xf32, #tpu.memory_space<vmem>>, vector<128x16xf32>
    %c0_5 = arith.constant 0 : index
    %c0_6 = arith.constant 0 : index
    %3 = vector.load %arg3[%c0_5, %c0_6] : memref<16x128xf32, #tpu.memory_space<vmem>>, vector<16x128xf32>
    %cst = arith.constant dense<0.000000e+00> : vector<128x128xf32>
    %4 = tpu.matmul %2, %3, %cst {dimension_numbers = #tpu.dot_dimension_numbers<[1], [0], [0], [1], [0, 0, 1, 1], [], []>} : vector<128x16xf32>, vector<16x128xf32>, vector<128x128xf32> -> vector<128x128xf32>
    %c0_7 = arith.constant 0 : index
    %c0_8 = arith.constant 0 : index
    %5 = vector.load %arg4[%c0_7, %c0_8] : memref<1x128xf32, #tpu.memory_space<vmem>>, vector<1x128xf32>
    %6 = vector.broadcast %5 : vector<1x128xf32> to vector<128x128xf32>
    %7 = arith.addf %4, %6 : vector<128x128xf32>
    %cst_9 = arith.constant 0.000000e+00 : f32
    %8 = vector.broadcast %cst_9 : f32 to vector<128x128xf32>
    %9 = arith.maximumf %7, %8 : vector<128x128xf32>
    %c0_10 = arith.constant 0 : index
    %c0_11 = arith.constant 0 : index
    %10 = vector.load %arg5[%c0_10, %c0_11] : memref<1x128xf32, #tpu.memory_space<vmem>>, vector<1x128xf32>
    %c0_12 = arith.constant 0 : index
    %c0_13 = arith.constant 0 : index
    %11 = vector.load %arg6[%c0_12, %c0_13] : memref<1x128xf32, #tpu.memory_space<vmem>>, vector<1x128xf32>
    %cst_14 = arith.constant dense<0.000000e+00> : vector<1x128xf32>
    %12 = tpu.matmul %10, %9, %cst_14 {dimension_numbers = #tpu.dot_dimension_numbers<[1], [1], [0], [0], [0, 0, 1, 0], [], []>} : vector<1x128xf32>, vector<128x128xf32>, vector<1x128xf32> -> vector<1x128xf32>
    %cst_15 = arith.constant dense<0.000000e+00> : vector<128x1xf32>
    %13 = tpu.matmul %9, %11, %cst_15 {dimension_numbers = #tpu.dot_dimension_numbers<[1], [1], [0], [0], [0, 0, 1, 0], [], []>} : vector<128x128xf32>, vector<1x128xf32>, vector<128x1xf32> -> vector<128x1xf32>
    %14 = vector.broadcast %13 : vector<128x1xf32> to vector<128x128xf32>
    %15 = vector.broadcast %12 : vector<1x128xf32> to vector<128x128xf32>
    %16 = arith.addf %14, %15 : vector<128x128xf32>
    %17 = math.tanh %16 : vector<128x128xf32>
    %18 = arith.mulf %1, %17 : vector<128x128xf32>
    %19 = arith.truncf %18 : vector<128x128xf32> to vector<128x128xbf16>
    %20 = arith.truncf %9 : vector<128x128xf32> to vector<128x128xbf16>
    %cst_16 = arith.constant dense<0.000000e+00> : vector<128x128xf32>
    %21 = tpu.matmul %19, %20, %cst_16 {dimension_numbers = #tpu.dot_dimension_numbers<[1], [0], [0], [1], [0, 0, 1, 1], [], []>} : vector<128x128xbf16>, vector<128x128xbf16>, vector<128x128xf32> -> vector<128x128xf32>
    %22 = vector.broadcast %0 : vector<1x1xf32> to vector<128x128xf32>
    %23 = arith.mulf %22, %9 : vector<128x128xf32>
    %24 = arith.addf %21, %23 : vector<128x128xf32>
    %cst_17 = arith.constant dense<0.000000e+00> : vector<1x128xf32>
    %25 = tpu.matmul %10, %24, %cst_17 {dimension_numbers = #tpu.dot_dimension_numbers<[1], [1], [0], [0], [0, 0, 1, 0], [], []>} : vector<1x128xf32>, vector<128x128xf32>, vector<1x128xf32> -> vector<1x128xf32>
    %cst_18 = arith.constant dense<0.000000e+00> : vector<128x1xf32>
    %26 = tpu.matmul %24, %11, %cst_18 {dimension_numbers = #tpu.dot_dimension_numbers<[1], [1], [0], [0], [0, 0, 1, 0], [], []>} : vector<128x128xf32>, vector<1x128xf32>, vector<128x1xf32> -> vector<128x1xf32>
    %27 = vector.broadcast %26 : vector<128x1xf32> to vector<128x128xf32>
    %28 = vector.broadcast %25 : vector<1x128xf32> to vector<128x128xf32>
    %29 = arith.addf %27, %28 : vector<128x128xf32>
    %30 = math.tanh %29 : vector<128x128xf32>
    %31 = arith.mulf %1, %30 : vector<128x128xf32>
    %32 = arith.truncf %31 : vector<128x128xf32> to vector<128x128xbf16>
    %33 = arith.truncf %24 : vector<128x128xf32> to vector<128x128xbf16>
    %cst_19 = arith.constant dense<0.000000e+00> : vector<128x128xf32>
    %34 = tpu.matmul %32, %33, %cst_19 {dimension_numbers = #tpu.dot_dimension_numbers<[1], [0], [0], [1], [0, 0, 1, 1], [], []>} : vector<128x128xbf16>, vector<128x128xbf16>, vector<128x128xf32> -> vector<128x128xf32>
    %35 = vector.broadcast %0 : vector<1x1xf32> to vector<128x128xf32>
    %36 = arith.mulf %35, %9 : vector<128x128xf32>
    %37 = arith.addf %34, %36 : vector<128x128xf32>
    %cst_20 = arith.constant 0.000000e+00 : f32
    %38 = vector.broadcast %cst_20 : f32 to vector<128x128xf32>
    %39 = arith.maximumf %37, %38 : vector<128x128xf32>
    %c0_21 = arith.constant 0 : index
    %c0_22 = arith.constant 0 : index
    %40 = vector.load %arg7[%c0_21, %c0_22] : memref<128x128xf32, #tpu.memory_space<vmem>>, vector<128x128xf32>
    %cst_23 = arith.constant dense<0.000000e+00> : vector<128x128xf32>
    %41 = tpu.matmul %39, %40, %cst_23 {dimension_numbers = #tpu.dot_dimension_numbers<[1], [0], [0], [1], [0, 0, 1, 1], [], []>} : vector<128x128xf32>, vector<128x128xf32>, vector<128x128xf32> -> vector<128x128xf32>
    %c0_24 = arith.constant 0 : index
    %c0_25 = arith.constant 0 : index
    %42 = vector.load %arg8[%c0_24, %c0_25] : memref<1x128xf32, #tpu.memory_space<vmem>>, vector<1x128xf32>
    %43 = vector.broadcast %42 : vector<1x128xf32> to vector<128x128xf32>
    %44 = arith.addf %41, %43 : vector<128x128xf32>
    %cst_26 = arith.constant dense<0xFF800000> : vector<128xf32>
    %45 = vector.multi_reduction <maximumf>, %44, %cst_26 [1] : vector<128x128xf32> to vector<128xf32>
    %46 = vector.shape_cast %45 : vector<128xf32> to vector<128x1xf32>
    %47 = vector.broadcast %46 : vector<128x1xf32> to vector<128x128xf32>
    %48 = arith.subf %44, %47 : vector<128x128xf32>
    %49 = math.exp %48 : vector<128x128xf32>
    %cst_27 = arith.constant dense<0.000000e+00> : vector<128xf32>
    %50 = vector.multi_reduction <add>, %49, %cst_27 [1] : vector<128x128xf32> to vector<128xf32>
    %51 = vector.shape_cast %50 : vector<128xf32> to vector<128x1xf32>
    %52 = tpu.reciprocal %51 {approx = true} : vector<128x1xf32> -> vector<128x1xf32>
    %53 = vector.broadcast %52 : vector<128x1xf32> to vector<128x128xf32>
    %54 = arith.mulf %49, %53 : vector<128x128xf32>
    %c0_28 = arith.constant 0 : index
    %c0_29 = arith.constant 0 : index
    %55 = vector.load %arg11[%c0_28, %c0_29] : memref<128x128xf32, #tpu.memory_space<vmem>>, vector<128x128xf32>
    tpu.vector_store %arg11[%c0_28, %c0_29], %54 {strides = array<i32>} : memref<128x128xf32, #tpu.memory_space<vmem>>, vector<128x128xf32>,
    %56 = vector.broadcast %46 : vector<128x1xf32> to vector<128x128xf32>
    %57 = arith.subf %44, %56 : vector<128x128xf32>
    %58 = math.log %51 : vector<128x1xf32>
    %59 = vector.broadcast %58 : vector<128x1xf32> to vector<128x128xf32>
    %60 = arith.subf %57, %59 : vector<128x128xf32>
    %c0_30 = arith.constant 0 : index
    %c0_31 = arith.constant 0 : index
    %61 = vector.load %arg9[%c0_30, %c0_31] : memref<128x128xf32, #tpu.memory_space<vmem>>, vector<128x128xf32>
    tpu.vector_store %arg9[%c0_30, %c0_31], %60 {strides = array<i32>} : memref<128x128xf32, #tpu.memory_space<vmem>>, vector<128x128xf32>,
    %62 = tpu.iota {dimensions = array<i32: 1>} : vector<128x128xi32>
    %63 = vector.broadcast %46 : vector<128x1xf32> to vector<128x128xf32>
    %64 = arith.cmpf oeq, %44, %63 : vector<128x128xf32>
    %c128_i32 = arith.constant 128 : i32
    %65 = vector.broadcast %c128_i32 : i32 to vector<128x128xi32>
    %66 = arith.select %64, %62, %65 : vector<128x128xi1>, vector<128x128xi32>
    %cst_32 = arith.constant dense<2147483647> : vector<128xi32>
    %67 = vector.multi_reduction <minsi>, %66, %cst_32 [1] : vector<128x128xi32> to vector<128xi32>
    %68 = vector.shape_cast %67 : vector<128xi32> to vector<128x1xi32>
    %69 = vector.broadcast %68 : vector<128x1xi32> to vector<128x128xi32>
    %70 = arith.cmpi eq, %62, %69 : vector<128x128xi32>
    %cst_33 = arith.constant 0xFF800000 : f32
    %71 = vector.broadcast %cst_33 : f32 to vector<128x128xf32>
    %72 = arith.select %70, %71, %44 : vector<128x128xi1>, vector<128x128xf32>
    %cst_34 = arith.constant dense<0xFF800000> : vector<128xf32>
    %73 = vector.multi_reduction <maximumf>, %72, %cst_34 [1] : vector<128x128xf32> to vector<128xf32>
    %74 = vector.shape_cast %73 : vector<128xf32> to vector<128x1xf32>
    %75 = arith.subf %74, %46 : vector<128x1xf32>
    %cst_35 = arith.constant dense<0.000000e+00> : vector<1xf32>
    %76 = vector.multi_reduction <add>, %75, %cst_35 [0] : vector<128x1xf32> to vector<1xf32>
    %77 = vector.shape_cast %76 : vector<1xf32> to vector<1x1xf32>
    %cst_36 = arith.constant 1.280000e+02 : f32
    %78 = vector.broadcast %cst_36 : f32 to vector<1x1xf32>
    %79 = arith.divf %77, %78 : vector<1x1xf32>
    %c0_37 = arith.constant 0 : index
    %c0_38 = arith.constant 0 : index
    %80 = vector.load %arg10[%c0_37, %c0_38] : memref<1x1xf32, #tpu.memory_space<vmem>>, vector<1x1xf32>
    tpu.vector_store %arg10[%c0_37, %c0_38], %79 {strides = array<i32>} : memref<1x1xf32, #tpu.memory_space<vmem>>, vector<1x1xf32>,
    return
  }
}

</mosaic_0001>

<bundles_post_ra>
// kernel: net_forward.1
= control target key start
LH: loop header
LB: loop body
LE: loop exit
PB: predicated region body
PF: predicated region fallthrough
CT: control target
= control target key end

     0   :  { %s3586_s0 = inlined_call_operand.<no memory space> [shape: f32[1,1], index: 0, kind: input, shape index: {}]   ;;  %s3587_s1 = inlined_call_operand.vmem [shape: f32[128,16], index: 1, kind: input, shape index: {}]   ;;  %s3588_s2 = inlined_call_operand.vmem [shape: f32[128,128], index: 2, kind: input, shape index: {}]   ;;  %s3589_s3 = inlined_call_operand.vmem [shape: f32[16,128], index: 3, kind: input, shape index: {}]   ;;  %s3590_s4 = inlined_call_operand.vmem [shape: f32[1,128], index: 4, kind: input, shape index: {}]   ;;  %s3591_s5 = inlined_call_operand.vmem [shape: f32[1,128], index: 5, kind: input, shape index: {}]   ;;  %s3592_s6 = inlined_call_operand.vmem [shape: f32[1,128], index: 6, kind: input, shape index: {}]   ;;  %s3593_s7 = inlined_call_operand.vmem [shape: f32[128,128], index: 7, kind: input, shape index: {}]   ;;  %s3594_s8 = inlined_call_operand.vmem [shape: f32[1,128], index: 8, kind: input, shape index: {}]   ;;  %s3595_s9 = inlined_call_operand.vmem [shape: f32[128,128], index: 9, kind: output, shape index: {0}]   ;;  %s3596_s10 = inlined_call_operand.hbm [shape: f32[1,1], index: 10, kind: output, shape index: {1}]   ;;  %s3597_s11 = inlined_call_operand.vmem [shape: f32[128,128], index: 11, kind: output, shape index: {2}]  }
   0x1   :  { %v17_v0 = vstv %s3586_s0 }
   0x2   :  { %18 = vst [vmem:[#allocation2] sm:$0x1] %v17_v0 }
   0x3   :  { %v73_v1 = vld [vmem:[%s3589_s3 + $0x8] sm:$0xff]  ;;  %v72_v2 = vld [vmem:[%s3589_s3] sm:$0xff]  ;;  %vm81_vm0 = vcmask 130048   ;;  %v58_v5 = vld [vmem:[%s3587_s1 + $0x10] sm:$0xff] }
   0x4   :  { %v56_v3 = vld [vmem:[%s3587_s1] sm:$0xff]  ;;  %1819 = vmatprep.subr.mxu0 %v73_v1  ;;  %v57_v4 = vld [vmem:[%s3587_s1 + $0x8] sm:$0xff]  ;;  %v59_v6 = vld [vmem:[%s3587_s1 + $0x18] sm:$0xff] }
   0x5   :  { %1823 = vmatprep.mubr.msk.f32.mxu0 %vm81_vm0, %v56_v3  ;;  %1820 = vmatpush3.msra.mxu0 %v73_v1 }
   0x6   :  { %1821 = vmatprep.subr.mxu0 %v72_v2 }
   0x7   :  { %1822 = vmatpush3.msra.mxu0 %v72_v2 }
   0x8   :  { %1824 = vmatmul.mubr.msk.f32.vlgmr.msra.gmra.mxu0 %vm81_vm0, %v57_v4 }
   0x9   :  { %1826 = vmatprep.mubr.msk.f32.mxu0 %vm81_vm0, %v58_v5 }
   0xa   :  { %19 = vsyncpa [#allocation4], 0  ;;  %v60_v7 = vld [vmem:[%s3587_s1 + $0x20] sm:$0xff]  ;;  %v61_v8 = vld [vmem:[%s3587_s1 + $0x28] sm:$0xff]  ;;  %v2256_v19 = vmov 0.0   ;;  %v2257_v20 = vmov 0  }
   0xb   :  { %v62_v9 = vld [vmem:[%s3587_s1 + $0x30] sm:$0xff]  ;;  %v63_v10 = vld [vmem:[%s3587_s1 + $0x38] sm:$0xff]  ;;  %v64_v11 = vld [vmem:[%s3587_s1 + $0x40] sm:$0xff]  ;;  %1847 = vmatprep.subr.mxu1 %v2256_v19  ;;  %2073 = vset.pattern.permute.xlu0 %v2257_v20  ;;  %vm2258_vm1 = vmmov 0  }
   0xc   :  { %1827 = vmatmul.mubr.msk.f32.gmra.mxu0 %vm81_vm0, %v59_v6  ;;  %v65_v12 = vld [vmem:[%s3587_s1 + $0x48] sm:$0xff]  ;;  %v66_v13 = vld [vmem:[%s3587_s1 + $0x50] sm:$0xff]  ;;  %v67_v14 = vld [vmem:[%s3587_s1 + $0x58] sm:$0xff]  ;;  %1879 = vmatprep.mubr.msk.f32.mxu1 %vm2258_vm1, %v2256_v19 }
   0xd   :  { %1829 = vmatprep.mubr.msk.f32.mxu0 %vm81_vm0, %v60_v7  ;;  %v68_v15 = vld [vmem:[%s3587_s1 + $0x60] sm:$0xff]  ;;  %v69_v16 = vld [vmem:[%s3587_s1 + $0x68] sm:$0xff]  ;;  %v70_v17 = vld [vmem:[%s3587_s1 + $0x70] sm:$0xff] }
   0xe   :  { %v71_v18 = vld [vmem:[%s3587_s1 + $0x78] sm:$0xff]  ;;  %v2399_v22 = vld [vmem:[%s3590_s4] ss:$0 sm:$0xff] }
   0xf   :  { %v2409_v30 = vld [vmem:[%s3592_s6] ss:$0 sm:$0xff] }
  0x10   :  { %1830 = vmatmul.mubr.msk.f32.gmra.mxu0 %vm81_vm0, %v61_v8 }
  0x11   :  { %1832 = vmatprep.mubr.msk.f32.mxu0 %vm81_vm0, %v62_v9 }
  0x14   :  { %1833 = vmatmul.mubr.msk.f32.gmra.mxu0 %vm81_vm0, %v63_v10 }
  0x15   :  { %1835 = vmatprep.mubr.msk.f32.mxu0 %vm81_vm0, %v64_v11 }
  0x18   :  { %1836 = vmatmul.mubr.msk.f32.gmra.mxu0 %vm81_vm0, %v65_v12 }
  0x19   :  { %1838 = vmatprep.mubr.msk.f32.mxu0 %vm81_vm0, %v66_v13 }
  0x1c   :  { %1839 = vmatmul.mubr.msk.f32.gmra.mxu0 %vm81_vm0, %v67_v14 }
  0x1d   :  { %1841 = vmatprep.mubr.msk.f32.mxu0 %vm81_vm0, %v68_v15 }
  0x20   :  { %1842 = vmatmul.mubr.msk.f32.gmra.mxu0 %vm81_vm0, %v69_v16 }
  0x21   :  { %1844 = vmatprep.mubr.msk.f32.mxu0 %vm81_vm0, %v70_v17 }
  0x24   :  { %1845 = vmatmul.mubr.msk.f32.gmra.mxu0 %vm81_vm0, %v71_v18 }
  0xc8   :  { %v1825_v21 = vpop.f32.mrf.mxu0 }
  0xc9   :  { %v202_v24 = vadd.f32 %v1825_v21, %v2399_v22 }
  0xca   :  { %v196_v23 = vpop.f32.mrf.mxu0 }
  0xcb   :  { %v197_v25 = vadd.f32 %v2399_v22, %v196_v23  ;;  %v2411_v31 = vmax.f32 %v202_v24, 0.0 }
  0xcc   :  { %v1828_v26 = vpop.f32.mrf.mxu0 }
  0xcd   :  { %v2403_v27 = vmax.f32 %v197_v25, 0.0  ;;  %v212_v28 = vadd.f32 %v1828_v26, %v2399_v22  ;;  %v370_v41 = vmul.f32 %v2409_v30, %v2411_v31 }
  0xce   :  { %v206_v29 = vpop.f32.mrf.mxu0 }
  0xcf   :  { %v2413_v32 = vmax.f32 %v212_v28, 0.0  ;;  %v207_v33 = vadd.f32 %v2399_v22, %v206_v29  ;;  %v369_v34 = vmul.f32 %v2409_v30, %v2403_v27 }
  0xd0   :  { %v1831_v35 = vpop.f32.mrf.mxu0 }
  0xd1   :  { %v2418_v36 = vmax.f32 %v207_v33, 0.0  ;;  %v222_v37 = vadd.f32 %v1831_v35, %v2399_v22  ;;  %385 = vadd.xlane.f32.xlu0 %v369_v34  ;;  %v372_v38 = vmul.f32 %v2409_v30, %v2413_v32  ;;  %v1701_v35 = vld [vmem:[#allocation2] ss:$0 sm:$0xff] }
  0xd2   :  { %v216_v39 = vpop.f32.mrf.mxu0 }
  0xd3   :  { %v217_v40 = vadd.f32 %v2399_v22, %v216_v39  ;;  %391 = vadd.xlane.f32.xlu1 %v372_v38  ;;  %v2426_v43 = vmax.f32 %v222_v37, 0.0  ;;  %v371_v46 = vmul.f32 %v2409_v30, %v2418_v36  ;;  %v478_v34 = vpack.c.bf16 %v2413_v32, %v2418_v36  ;;  %v2537_v38 = vld [vmem:[%s3591_s5] sm:$0x1] }
  0xd4   :  { %v1834_v42 = vpop.f32.mrf.mxu0  ;;  %v477_v37 = vpack.c.bf16 %v2411_v31, %v2403_v27 }
  0xd5   :  { %v2428_v44 = vmax.f32 %v217_v40, 0.0  ;;  %v232_v45 = vadd.f32 %v1834_v42, %v2399_v22  ;;  %387 = vadd.xlane.f32.xlu0 %v370_v41  ;;  %v374_v54 = vmul.f32 %v2409_v30, %v2426_v43 }
  0xd6   :  { %v226_v47 = vpop.f32.mrf.mxu0 }
  0xd7   :  { %v227_v48 = vadd.f32 %v2399_v22, %v226_v47  ;;  %389 = vadd.xlane.f32.xlu1 %v371_v46  ;;  %v373_v49 = vmul.f32 %v2409_v30, %v2428_v44  ;;  %v2436_v51 = vmax.f32 %v232_v45, 0.0  ;;  %v479_v33 = vpack.c.bf16 %v2426_v43, %v2428_v44 }
  0xd8   :  { %v1837_v50 = vpop.f32.mrf.mxu0  ;;  %v3598_v45 = vlaneseq }
  0xd9   :  { %v2438_v52 = vmax.f32 %v227_v48, 0.0  ;;  %v242_v53 = vadd.f32 %v1837_v50, %v2399_v22  ;;  %393 = vadd.xlane.f32.xlu0 %v373_v49  ;;  %v376_v62 = vmul.f32 %v2409_v30, %v2436_v51 }
  0xda   :  { %v236_v55 = vpop.f32.mrf.mxu0  ;;  %v2541_v48 = vshrl.u32 %v3598_v45, 7 }
  0xdb   :  { %v237_v56 = vadd.f32 %v2399_v22, %v236_v55  ;;  %395 = vadd.xlane.f32.xlu1 %v374_v54  ;;  %v375_v57 = vmul.f32 %v2409_v30, %v2438_v52  ;;  %v2446_v59 = vmax.f32 %v242_v53, 0.0  ;;  %v480_v29 = vpack.c.bf16 %v2436_v51, %v2438_v52 }
  0xdc   :  { %v1840_v58 = vpop.f32.mrf.mxu0  ;;  %v419_v50 = vsub.s32 0, %v2541_v48 }
  0xdd   :  { %v2448_v60 = vmax.f32 %v237_v56, 0.0  ;;  %v252_v61 = vadd.f32 %v1840_v58, %v2399_v22  ;;  %397 = vadd.xlane.f32.xlu0 %v375_v57  ;;  %v378_v6 = vmul.f32 %v2409_v30, %v2446_v59 }
  0xde   :  { %v246_v63 = vpop.f32.mrf.mxu0 }
  0xdf   :  { %v247_v0 = vadd.f32 %v2399_v22, %v246_v63  ;;  %399 = vadd.xlane.f32.xlu1 %v376_v62  ;;  %v377_v1 = vmul.f32 %v2409_v30, %v2448_v60  ;;  %v2456_v3 = vmax.f32 %v252_v61, 0.0  ;;  %v481_v28 = vpack.c.bf16 %v2446_v59, %v2448_v60 }
  0xe0   :  { %v1843_v2 = vpop.f32.mrf.mxu0 }
  0xe1   :  { %v2458_v4 = vmax.f32 %v247_v0, 0.0  ;;  %v262_v5 = vadd.f32 %v1843_v2, %v2399_v22  ;;  %401 = vadd.xlane.f32.xlu0 %v377_v1  ;;  %v380_v14 = vmul.f32 %v2409_v30, %v2456_v3 }
  0xe2   :  { %v256_v7 = vpop.f32.mrf.mxu0 }
  0xe3   :  { %v257_v8 = vadd.f32 %v2399_v22, %v256_v7  ;;  %403 = vadd.xlane.f32.xlu1 %v378_v6  ;;  %v379_v9 = vmul.f32 %v2409_v30, %v2458_v4  ;;  %v2466_v11 = vmax.f32 %v262_v5, 0.0  ;;  %v482_v26 = vpack.c.bf16 %v2456_v3, %v2458_v4 }
  0xe4   :  { %v1846_v10 = vpop.f32.mrf.mxu0 }
  0xe5   :  { %v2468_v12 = vmax.f32 %v257_v8, 0.0  ;;  %v272_v13 = vadd.f32 %v1846_v10, %v2399_v22  ;;  %405 = vadd.xlane.f32.xlu0 %v379_v9  ;;  %v382_v21 = vmul.f32 %v2409_v30, %v2466_v11 }
  0xe6   :  { %v266_v15 = vpop.f32.mrf.mxu0 }
  0xe7   :  { %v2473_v16 = vmax.f32 %v272_v13, 0.0  ;;  %v267_v17 = vadd.f32 %v2399_v22, %v266_v15  ;;  %407 = vadd.xlane.f32.xlu1 %v380_v14  ;;  %v381_v18 = vmul.f32 %v2409_v30, %v2468_v12  ;;  %v483_v24 = vpack.c.bf16 %v2466_v11, %v2468_v12 }
  0xe9   :  { %v2478_v20 = vmax.f32 %v267_v17, 0.0  ;;  %1848 = vmatpush3.xpose.msra.mxu1 %v2473_v16  ;;  %409 = vadd.xlane.f32.xlu0 %v381_v18  ;;  %v384_v25 = vmul.f32 %v2409_v30, %v2473_v16  ;;  %v2549_v18 = vld [vmem:[%s3588_s2] sm:$0xff] }
  0xea   :  { %1849 = vmatprep.subr.mxu1 %v2256_v19 }
  0xeb   :  { %411 = vadd.xlane.f32.xlu1 %v382_v21  ;;  %v484_v23 = vpack.c.bf16 %v2473_v16, %v2478_v20  ;;  %v383_v22 = vmul.f32 %v2409_v30, %v2478_v20 }
  0xed   :  { %1850 = vmatpush3.xpose.msra.mxu1 %v2478_v20  ;;  %1882 = vmatprep.subr.bf16.mxu0 %v484_v23 }
  0xee   :  { %413 = vadd.xlane.f32.xlu0 %v383_v22  ;;  %1883 = vmatpush3.bf16.msra.mxu0 %v484_v23  ;;  %v2554_v23 = vld [vmem:[%s3588_s2 + $0x8] sm:$0xff] }
  0xef   :  { %1884 = vmatprep.subr.bf16.mxu0 %v483_v24  ;;  %415 = vadd.xlane.f32.xlu1 %v384_v25  ;;  %v2559_v25 = vld [vmem:[%s3588_s2 + $0x10] sm:$0xff] }
  0xf0   :  { %1851 = vmatprep.subr.mxu1 %v2256_v19 }
  0xf1   :  { %1852 = vmatpush3.xpose.msra.mxu1 %v2466_v11 }
  0xf2   :  { %1885 = vmatpush3.bf16.msra.mxu0 %v483_v24  ;;  %1853 = vmatprep.subr.mxu1 %v2256_v19 }
  0xf3   :  { %1886 = vmatprep.subr.bf16.mxu0 %v482_v26 }
  0xf5   :  { %1854 = vmatpush3.xpose.msra.mxu1 %v2468_v12 }
  0xf6   :  { %1887 = vmatpush3.bf16.msra.mxu0 %v482_v26  ;;  %1855 = vmatprep.subr.mxu1 %v2256_v19 }
  0xf7   :  { %1888 = vmatprep.subr.bf16.mxu0 %v481_v28 }
  0xf9   :  { %1856 = vmatpush3.xpose.msra.mxu1 %v2456_v3 }
  0xfa   :  { %1889 = vmatpush3.bf16.msra.mxu0 %v481_v28  ;;  %1857 = vmatprep.subr.mxu1 %v2256_v19 }
  0xfb   :  { %1890 = vmatprep.subr.bf16.mxu0 %v480_v29 }
  0xfd   :  { %1858 = vmatpush3.xpose.msra.mxu1 %v2458_v4 }
  0xfe   :  { %1891 = vmatpush3.bf16.msra.mxu0 %v480_v29  ;;  %1859 = vmatprep.subr.mxu1 %v2256_v19  ;;  %v2565_v29 = vld [vmem:[%s3588_s2 + $0x18] sm:$0xff] }
  0xff   :  { %1892 = vmatprep.subr.bf16.mxu0 %v479_v33 }
 0x101   :  { %1860 = vmatpush3.xpose.msra.mxu1 %v2446_v59 }
 0x102   :  { %1893 = vmatpush3.bf16.msra.mxu0 %v479_v33  ;;  %1861 = vmatprep.subr.mxu1 %v2256_v19 }
 0x103   :  { %1894 = vmatprep.subr.bf16.mxu0 %v478_v34 }
 0x104   :  { %491 = vperm.xlu0 %2073, %v1701_v35   ;;  %v2571_v35 = vld [vmem:[%s3588_s2 + $0x20] sm:$0xff] }
 0x105   :  { %1862 = vmatpush3.xpose.msra.mxu1 %v2448_v60 }
 0x106   :  { %1895 = vmatpush3.bf16.msra.mxu0 %v478_v34  ;;  %1863 = vmatprep.subr.mxu1 %v2256_v19 }
 0x107   :  { %1896 = vmatprep.subr.bf16.mxu0 %v477_v37 }
 0x109   :  { %1864 = vmatpush3.xpose.msra.mxu1 %v2436_v51 }
 0x10a   :  { %1897 = vmatpush3.bf16.msra.mxu0 %v477_v37  ;;  %1865 = vmatprep.subr.mxu1 %v2256_v19 }
 0x10b   :  { %1914 = vmatprep.subr.mxu0 %v2256_v19 }
 0x10d   :  { %1866 = vmatpush3.xpose.msra.mxu1 %v2438_v52 }
 0x10e   :  { %1867 = vmatprep.subr.mxu1 %v2256_v19 }
 0x111   :  { %1868 = vmatpush3.xpose.msra.mxu1 %v2426_v43 }
 0x112   :  { %1869 = vmatprep.subr.mxu1 %v2256_v19 }
 0x115   :  { %1870 = vmatpush3.xpose.msra.mxu1 %v2428_v44 }
 0x116   :  { %1871 = vmatprep.subr.mxu1 %v2256_v19 }
 0x119   :  { %1872 = vmatpush3.xpose.msra.mxu1 %v2413_v32 }
 0x11a   :  { %1873 = vmatprep.subr.mxu1 %v2256_v19 }
 0x11d   :  { %1874 = vmatpush3.xpose.msra.mxu1 %v2418_v36 }
 0x11e   :  { %1875 = vmatprep.subr.mxu1 %v2256_v19 }
 0x121   :  { %1876 = vmatpush3.xpose.msra.mxu1 %v2411_v31 }
 0x122   :  { %1877 = vmatprep.subr.mxu1 %v2256_v19 }
 0x125   :  { %1878 = vmatpush3.xpose.msra.mxu1 %v2403_v27 }
 0x128   :  { %1880 = vmatmul.mubr.f32.vlgmr.msra.gmra.mxu1 %v2537_v38 }
 0x15a   :  { %v386_v39 = vpop.xlane.xlu0 %385 }
 0x15c   :  { %v392_v40 = vpop.xlane.xlu1 %391 }
 0x15e   :  { %v388_v41 = vpop.xlane.xlu0 %387 }
 0x160   :  { %v390_v42 = vpop.xlane.xlu1 %389 }
 0x162   :  { %v394_v46 = vpop.xlane.xlu0 %393 }
 0x164   :  { %v396_v47 = vpop.xlane.xlu1 %395 }
 0x166   :  { %v398_v49 = vpop.xlane.xlu0 %397 }
 0x168   :  { %v400_v53 = vpop.xlane.xlu1 %399 }
 0x16a   :  { %v402_v57 = vpop.xlane.xlu0 %401 }
 0x16c   :  { %v404_v63 = vpop.xlane.xlu1 %403 }
 0x16e   :  { %v406_v7 = vpop.xlane.xlu0 %405 }
 0x170   :  { %v408_v9 = vpop.xlane.xlu1 %407 }
 0x172   :  { %v410_v14 = vpop.xlane.xlu0 %409 }
 0x174   :  { %v412_v17 = vpop.xlane.xlu1 %411 }
 0x1e8   :  { %v359_v54 = vpop.f32.mrf.mxu1 }
 0x1e9   :  { %v420_v55 = vrot.slane %v359_v54, %v419_v50 }
 0x1ea   :  { %v1881_v56 = vpop.f32.mrf.mxu1 }
 0x1eb   :  { %v421_v58 = vadd.f32 %v420_v55, %v386_v39  ;;  %v422_v61 = vadd.f32 %v420_v55, %v388_v41  ;;  %v423_v62 = vadd.f32 %v420_v55, %v390_v42  ;;  %v424_v0 = vadd.f32 %v420_v55, %v392_v40  ;;  %v2577_v40 = vld [vmem:[%s3588_s2 + $0x28] sm:$0xff]  ;;  %v414_v42 = vpop.xlane.xlu0 %413 }
 0x1ec   :  { %v425_v1 = vadd.f32 %v420_v55, %v394_v46  ;;  %v426_v2 = vadd.f32 %v420_v55, %v396_v47  ;;  %v427_v5 = vadd.f32 %v420_v55, %v398_v49  ;;  %v428_v6 = vadd.f32 %v420_v55, %v400_v53  ;;  %v416_v53 = vpop.xlane.xlu1 %415 }
 0x1ed   :  { %2074 = vtanh.f32 %v421_v58  ;;  %v429_v8 = vadd.f32 %v420_v55, %v402_v57  ;;  %v430_v10 = vadd.f32 %v420_v55, %v404_v63  ;;  %v431_v13 = vadd.f32 %v420_v55, %v406_v7 }
 0x1ee   :  { %2076 = vtanh.f32 %v422_v61  ;;  %v432_v15 = vadd.f32 %v420_v55, %v408_v9  ;;  %v433_v21 = vadd.f32 %v420_v55, %v410_v14  ;;  %v434_v22 = vadd.f32 %v420_v55, %v412_v17 }
 0x1ef   :  { %2078 = vtanh.f32 %v423_v62  ;;  %v435_v56 = vadd.f32 %v420_v55, %v414_v42  ;;  %v436_v62 = vadd.f32 %v420_v55, %v416_v53  ;;  %v2600_v55 = vld [vmem:[%s3588_s2 + $0x48] sm:$0xff] }
 0x1f0   :  { %2080 = vtanh.f32 %v424_v0  ;;  %v2585_v0 = vld [vmem:[%s3588_s2 + $0x30] sm:$0xff] }
 0x1f1   :  { %2082 = vtanh.f32 %v425_v1  ;;  %v2590_v1 = vld [vmem:[%s3588_s2 + $0x38] sm:$0xff] }
 0x1f2   :  { %2084 = vtanh.f32 %v426_v2 }
 0x1f3   :  { %2086 = vtanh.f32 %v427_v5 }
 0x1f4   :  { %2088 = vtanh.f32 %v428_v6  ;;  %v2595_v6 = vld [vmem:[%s3588_s2 + $0x40] sm:$0xff] }
 0x1f5   :  { %2090 = vtanh.f32 %v429_v8 }
 0x1f6   :  { %2092 = vtanh.f32 %v430_v10 }
 0x1f7   :  { %2094 = vtanh.f32 %v431_v13 }
 0x1f8   :  { %2096 = vtanh.f32 %v432_v15 }
 0x1f9   :  { %2098 = vtanh.f32 %v433_v21 }
 0x1fa   :  { %v2075_v24 = vpop.eup %2074  ;;  %2100 = vtanh.f32 %v434_v22 }
 0x1fb   :  { %v2077_v26 = vpop.eup %2076  ;;  %v453_v28 = vmul.f32 %v2075_v24, %v2549_v18  ;;  %2102 = vtanh.f32 %v435_v56  ;;  %v2609_v24 = vld [vmem:[%s3588_s2 + $0x50] sm:$0xff]  ;;  %v2638_v56 = vld [vmem:[%s3588_s2 + $0x78] sm:$0xff] }
 0x1fc   :  { %v2079_v33 = vpop.eup %2078  ;;  %v454_v34 = vmul.f32 %v2077_v26, %v2554_v23  ;;  %2104 = vtanh.f32 %v436_v62  ;;  %v2614_v26 = vld [vmem:[%s3588_s2 + $0x58] sm:$0xff]  ;;  %v2644_v62 = vpop.permute.xlu0 %491 }
 0x1fd   :  { %v2081_v37 = vpop.eup %2080  ;;  %v455_v39 = vmul.f32 %v2079_v33, %v2559_v25  ;;  %v2619_v33 = vld [vmem:[%s3588_s2 + $0x60] sm:$0xff] }
 0x1fe   :  { %v2083_v41 = vpop.eup %2082  ;;  %v469_v46 = vpack.c.bf16 %v454_v34, %v453_v28  ;;  %v456_v47 = vmul.f32 %v2081_v37, %v2565_v29  ;;  %v2624_v34 = vld [vmem:[%s3588_s2 + $0x68] sm:$0xff] }
 0x1ff   :  { %v2085_v49 = vpop.eup %2084  ;;  %v457_v54 = vmul.f32 %v2083_v41, %v2571_v35 }
 0x200   :  { %v2087_v57 = vpop.eup %2086  ;;  %1898 = vmatprep.mubr.bf16.mxu0 %v469_v46  ;;  %v470_v58 = vpack.c.bf16 %v456_v47, %v455_v39  ;;  %v458_v61 = vmul.f32 %v2085_v49, %v2577_v40 }
 0x201   :  { %v2089_v63 = vpop.eup %2088  ;;  %v459_v8 = vmul.f32 %v2087_v57, %v2585_v0 }
 0x202   :  { %v2091_v2 = vpop.eup %2090  ;;  %1899 = vmatmul.mubr.bf16.vlgmr.msra.gmra.mxu0 %v470_v58  ;;  %v471_v5 = vpack.c.bf16 %v458_v61, %v457_v54  ;;  %v460_v9 = vmul.f32 %v2089_v63, %v2590_v1  ;;  %v2633_v54 = vld [vmem:[%s3588_s2 + $0x70] sm:$0xff]  ;;  %v2648_v63 = vmul.f32 %v2644_v62, %v2418_v36  ;;  %v2664_v36 = vmul.f32 %v2644_v62, %v2413_v32 }
 0x203   :  { %v2093_v7 = vpop.eup %2092  ;;  %v461_v10 = vmul.f32 %v2091_v2, %v2595_v6 }
 0x204   :  { %1902 = vmatprep.mubr.bf16.mxu0 %v471_v5  ;;  %v462_v13 = vmul.f32 %v2093_v7, %v2600_v55  ;;  %v2095_v14 = vpop.eup %2094  ;;  %v472_v17 = vpack.c.bf16 %v460_v9, %v459_v8  ;;  %v2655_v7 = vmul.f32 %v2644_v62, %v2403_v27 }
 0x205   :  { %v2097_v15 = vpop.eup %2096  ;;  %v463_v37 = vmul.f32 %v2095_v14, %v2609_v24 }
 0x206   :  { %v2099_v21 = vpop.eup %2098  ;;  %v473_v22 = vpack.c.bf16 %v462_v13, %v461_v10  ;;  %v464_v39 = vmul.f32 %v2097_v15, %v2614_v26 }
 0x207   :  { %v2101_v28 = vpop.eup %2100  ;;  %v465_v41 = vmul.f32 %v2099_v21, %v2619_v33  ;;  %v2673_v21 = vmul.f32 %v2644_v62, %v2411_v31 }
 0x208   :  { %v466_v42 = vmul.f32 %v2101_v28, %v2624_v34  ;;  %v2103_v46 = vpop.eup %2102  ;;  %v474_v47 = vpack.c.bf16 %v464_v39, %v463_v37  ;;  %v2682_v39 = vmul.f32 %v2644_v62, %v2438_v52  ;;  %v2698_v52 = vmul.f32 %v2644_v62, %v2456_v3 }
 0x209   :  { %v2105_v49 = vpop.eup %2104  ;;  %v467_v57 = vmul.f32 %v2103_v46, %v2633_v54 }
 0x20a   :  { %1903 = vmatmul.mubr.bf16.gmra.mxu0 %v472_v17  ;;  %v475_v53 = vpack.c.bf16 %v466_v42, %v465_v41  ;;  %v468_v58 = vmul.f32 %v2105_v49, %v2638_v56  ;;  %3642 = vst [vmem:[#allocation6_spill] sm:$0xff] %v2698_v52 }
 0x20b   :  { %1906 = vmatprep.mubr.bf16.mxu0 %v473_v22 }
 0x20c   :  { %v476_v61 = vpack.c.bf16 %v468_v58, %v467_v57 }
 0x212   :  { %1907 = vmatmul.mubr.bf16.gmra.mxu0 %v474_v47  ;;  %v2691_v47 = vmul.f32 %v2644_v62, %v2428_v44 }
 0x213   :  { %1910 = vmatprep.mubr.bf16.mxu0 %v475_v53 }
 0x21a   :  { %1911 = vmatmul.mubr.bf16.gmra.mxu0 %v476_v61  ;;  %v2704_v61 = vmul.f32 %v2644_v62, %v2436_v51 }
 0x21b   :  { %1946 = vmatprep.mubr.msk.f32.mxu0 %vm2258_vm1, %v2256_v19 }
 0x2c2   :  { %v1900_v2 = vpop.f32.mrf.mxu0 }
 0x2c3   :  { %v2651_v5 = vadd.f32 %v1900_v2, %v2648_v63 }
 0x2c4   :  { %v544_v8 = vpop.f32.mrf.mxu0 }
 0x2c5   :  { %v2658_v9 = vadd.f32 %v544_v8, %v2655_v7  ;;  %v679_v10 = vmul.f32 %v2409_v30, %v2651_v5 }
 0x2c6   :  { %v1901_v13 = vpop.f32.mrf.mxu0 }
 0x2c7   :  { %697 = vadd.xlane.f32.xlu1 %v679_v10  ;;  %v2667_v15 = vadd.f32 %v1901_v13, %v2664_v36  ;;  %v677_v27 = vmul.f32 %v2409_v30, %v2658_v9 }
 0x2c8   :  { %v547_v14 = vpop.f32.mrf.mxu0 }
 0x2c9   :  { %v2676_v28 = vadd.f32 %v547_v14, %v2673_v21  ;;  %v680_v32 = vmul.f32 %v2409_v30, %v2667_v15  ;;  %v2715_v14 = vmul.f32 %v2644_v62, %v2426_v43  ;;  %v2732_v43 = vmul.f32 %v2644_v62, %v2458_v4 }
 0x2ca   :  { %v1904_v17 = vpop.f32.mrf.mxu0 }
 0x2cb   :  { %693 = vadd.xlane.f32.xlu1 %v677_v27  ;;  %v2685_v42 = vadd.f32 %v1904_v17, %v2682_v39  ;;  %v678_v31 = vmul.f32 %v2409_v30, %v2676_v28  ;;  %v2722_v17 = vmul.f32 %v2644_v62, %v2478_v20 }
 0x2cc   :  { %v560_v22 = vpop.f32.mrf.mxu0 }
 0x2cd   :  { %v2694_v53 = vadd.f32 %v560_v22, %v2691_v47  ;;  %v683_v57 = vmul.f32 %v2409_v30, %v2685_v42  ;;  %3643 = vst [vmem:[#allocation7_spill] sm:$0xff] %v2722_v17  ;;  %v2726_v22 = vmul.f32 %v2644_v62, %v2473_v16  ;;  %v2744_v16 = vmul.f32 %v2644_v62, %v2466_v11 }
 0x2ce   :  { %v1905_v37 = vpop.f32.mrf.mxu0  ;;  %v2756_v11 = vmul.f32 %v2644_v62, %v2448_v60 }
 0x2cf   :  { %699 = vadd.xlane.f32.xlu1 %v680_v32  ;;  %v2708_v8 = vadd.f32 %v1905_v37, %v2704_v61  ;;  %v681_v3 = vmul.f32 %v2409_v30, %v2694_v53  ;;  %3644 = vst [vmem:[#allocation8_spill] sm:$0xff] %v2726_v22  ;;  %3646 = vst [vmem:[#allocation10_spill] sm:$0xff] %v2744_v16 }
 0x2d0   :  { %v563_v41 = vpop.f32.mrf.mxu0 }
 0x2d1   :  { %v2718_v27 = vadd.f32 %v563_v41, %v2715_v14  ;;  %v684_v32 = vmul.f32 %v2409_v30, %v2708_v8  ;;  %v2737_v41 = vmul.f32 %v2644_v62, %v2468_v12 }
 0x2d2   :  { %v1908_v46 = vpop.f32.mrf.mxu0 }
 0x2d3   :  { %695 = vadd.xlane.f32.xlu1 %v678_v31  ;;  %3645 = vst [vmem:[#allocation9_spill] sm:$0xff] %v2737_v41 }
 0x2d4   :  { %v576_v49 = vpop.f32.mrf.mxu0 }
 0x2d6   :  { %v1909_v58 = vpop.f32.mrf.mxu0 }
 0x2d7   :  { %v588_v44 = vadd.f32 %v1909_v58, %v2698_v52  ;;  %705 = vadd.xlane.f32.xlu1 %v683_v57  ;;  %v585_v57 = vadd.f32 %v1908_v46, %v2732_v43 }
 0x2d8   :  { %v579_v2 = vpop.f32.mrf.mxu0 }
 0x2d9   :  { %v688_v10 = vmul.f32 %v2409_v30, %v588_v44  ;;  %v790_v60 = vpack.c.bf16 %v588_v44, %v585_v57 }
 0x2da   :  { %v1912_v13 = vpop.f32.mrf.mxu0 }
 0x2db   :  { %715 = vadd.xlane.f32.xlu0 %v688_v10  ;;  %701 = vadd.xlane.f32.xlu1 %v681_v3  ;;  %v601_v31 = vadd.f32 %v1912_v13, %v2722_v17  ;;  %v682_v3 = vmul.f32 %v2409_v30, %v2718_v27  ;;  %v577_v13 = vadd.f32 %v576_v49, %v2756_v11 }
 0x2dc   :  { %v592_v51 = vpop.f32.mrf.mxu0  ;;  %v788_v49 = vpack.c.bf16 %v2708_v8, %v2685_v42 }
 0x2dd   :  { %v593_v4 = vadd.f32 %v592_v51, %v2737_v41  ;;  %v2761_v51 = vmul.f32 %v2644_v62, %v2446_v59 }
 0x2de   :  { %v1913_v37 = vpop.f32.mrf.mxu0 }
 0x2df   :  { %v2740_v20 = vadd.f32 %v1913_v37, %v2726_v22  ;;  %707 = vadd.xlane.f32.xlu1 %v684_v32  ;;  %3647 = vst [vmem:[#allocation11_spill] sm:$0xff] %v2761_v51  ;;  %v687_v32 = vmul.f32 %v2409_v30, %v585_v57  ;;  %v580_v37 = vadd.f32 %v579_v2, %v2761_v51 }
 0x2e0   :  { %v595_v58 = vpop.f32.mrf.mxu0  ;;  %v691_v2 = vmul.f32 %v2409_v30, %v601_v31 }
 0x2e1   :  { %v596_v10 = vadd.f32 %v595_v58, %v2744_v16  ;;  %1915 = vmatpush3.xpose.msra.mxu0 %v2740_v20  ;;  %v792_v12 = vpack.c.bf16 %v2740_v20, %v601_v31  ;;  %v685_v58 = vmul.f32 %v2409_v30, %v577_v13  ;;  %v789_v59 = vpack.c.bf16 %v580_v37, %v577_v13 }
 0x2e2   :  { %1916 = vmatprep.subr.mxu0 %v2256_v19  ;;  %v686_v62 = vmul.f32 %v2409_v30, %v580_v37 }
 0x2e3   :  { %1949 = vmatprep.subr.bf16.mxu1 %v792_v12  ;;  %703 = vadd.xlane.f32.xlu1 %v682_v3  ;;  %v791_v46 = vpack.c.bf16 %v596_v10, %v593_v4  ;;  %v689_v3 = vmul.f32 %v2409_v30, %v593_v4 }
 0x2e4   :  { %1950 = vmatpush3.bf16.msra.mxu1 %v792_v12  ;;  %v787_v12 = vpack.c.bf16 %v2718_v27, %v2694_v53 }
 0x2e5   :  { %1917 = vmatpush3.xpose.msra.mxu0 %v601_v31  ;;  %1951 = vmatprep.subr.bf16.mxu1 %v791_v46  ;;  %v690_v31 = vmul.f32 %v2409_v30, %v596_v10 }
 0x2e6   :  { %1918 = vmatprep.subr.mxu0 %v2256_v19 }
 0x2e7   :  { %713 = vadd.xlane.f32.xlu1 %v687_v32 }
 0x2e8   :  { %1952 = vmatpush3.bf16.msra.mxu1 %v791_v46 }
 0x2e9   :  { %1919 = vmatpush3.xpose.msra.mxu0 %v596_v10  ;;  %1953 = vmatprep.subr.bf16.mxu1 %v790_v60 }
 0x2ea   :  { %1920 = vmatprep.subr.mxu0 %v2256_v19 }
 0x2eb   :  { %709 = vadd.xlane.f32.xlu1 %v685_v58 }
 0x2ec   :  { %1954 = vmatpush3.bf16.msra.mxu1 %v790_v60 }
 0x2ed   :  { %1921 = vmatpush3.xpose.msra.mxu0 %v593_v4  ;;  %1955 = vmatprep.subr.bf16.mxu1 %v789_v59  ;;  %v692_v4 = vmul.f32 %v2409_v30, %v2740_v20  ;;  %v2806_v30 = vld [vmem:[%s3593_s7 + $0x78] sm:$0xff]  ;;  %v2875_v20 = vld [vmem:[%s3593_s7 + $0x28] sm:$0xff] }
 0x2ee   :  { %1922 = vmatprep.subr.mxu0 %v2256_v19 }
 0x2ef   :  { %711 = vadd.xlane.f32.xlu1 %v686_v62 }
 0x2f0   :  { %1956 = vmatpush3.bf16.msra.mxu1 %v789_v59 }
 0x2f1   :  { %1923 = vmatpush3.xpose.msra.mxu0 %v588_v44  ;;  %1957 = vmatprep.subr.bf16.mxu1 %v788_v49  ;;  %v786_v44 = vpack.c.bf16 %v2667_v15, %v2651_v5 }
 0x2f2   :  { %1924 = vmatprep.subr.mxu0 %v2256_v19 }
 0x2f3   :  { %721 = vadd.xlane.f32.xlu1 %v691_v2 }
 0x2f4   :  { %1958 = vmatpush3.bf16.msra.mxu1 %v788_v49 }
 0x2f5   :  { %1925 = vmatpush3.xpose.msra.mxu0 %v585_v57  ;;  %1959 = vmatprep.subr.bf16.mxu1 %v787_v12  ;;  %v785_v57 = vpack.c.bf16 %v2676_v28, %v2658_v9 }
 0x2f6   :  { %1926 = vmatprep.subr.mxu0 %v2256_v19 }
 0x2f7   :  { %717 = vadd.xlane.f32.xlu1 %v689_v3 }
 0x2f8   :  { %1960 = vmatpush3.bf16.msra.mxu1 %v787_v12 }
 0x2f9   :  { %1927 = vmatpush3.xpose.msra.mxu0 %v580_v37  ;;  %1961 = vmatprep.subr.bf16.mxu1 %v786_v44 }
 0x2fa   :  { %1928 = vmatprep.subr.mxu0 %v2256_v19 }
 0x2fb   :  { %719 = vadd.xlane.f32.xlu1 %v690_v31 }
 0x2fc   :  { %1962 = vmatpush3.bf16.msra.mxu1 %v786_v44 }
 0x2fd   :  { %1929 = vmatpush3.xpose.msra.mxu0 %v577_v13  ;;  %1963 = vmatprep.subr.bf16.mxu1 %v785_v57 }
 0x2fe   :  { %1930 = vmatprep.subr.mxu0 %v2256_v19 }
 0x2ff   :  { %723 = vadd.xlane.f32.xlu1 %v692_v4 }
 0x300   :  { %1964 = vmatpush3.bf16.msra.mxu1 %v785_v57 }
 0x301   :  { %1931 = vmatpush3.xpose.msra.mxu0 %v2708_v8  ;;  %2037 = vmatprep.subr.mxu1 %v2806_v30 }
 0x302   :  { %1932 = vmatprep.subr.mxu0 %v2256_v19 }
 0x305   :  { %1933 = vmatpush3.xpose.msra.mxu0 %v2685_v42  ;;  %v2854_v42 = vld [vmem:[%s3593_s7 + $0x40] sm:$0xff] }
 0x306   :  { %1934 = vmatprep.subr.mxu0 %v2256_v19 }
 0x309   :  { %1935 = vmatpush3.xpose.msra.mxu0 %v2718_v27  ;;  %v2868_v27 = vld [vmem:[%s3593_s7 + $0x30] sm:$0xff] }
 0x30a   :  { %1936 = vmatprep.subr.mxu0 %v2256_v19 }
 0x30d   :  { %1937 = vmatpush3.xpose.msra.mxu0 %v2694_v53  ;;  %v2861_v53 = vld [vmem:[%s3593_s7 + $0x38] sm:$0xff] }
 0x30e   :  { %1938 = vmatprep.subr.mxu0 %v2256_v19 }
 0x311   :  { %1939 = vmatpush3.xpose.msra.mxu0 %v2667_v15  ;;  %v2811_v15 = vld [vmem:[%s3593_s7 + $0x70] sm:$0xff] }
 0x312   :  { %1940 = vmatprep.subr.mxu0 %v2256_v19 }
 0x315   :  { %1941 = vmatpush3.xpose.msra.mxu0 %v2651_v5  ;;  %v2833_v5 = vld [vmem:[%s3593_s7 + $0x58] sm:$0xff] }
 0x316   :  { %1942 = vmatprep.subr.mxu0 %v2256_v19 }
 0x319   :  { %1943 = vmatpush3.xpose.msra.mxu0 %v2676_v28  ;;  %v2847_v28 = vld [vmem:[%s3593_s7 + $0x48] sm:$0xff] }
 0x31a   :  { %1944 = vmatprep.subr.mxu0 %v2256_v19  ;;  %v2819_v19 = vld [vmem:[%s3593_s7 + $0x68] sm:$0xff] }
 0x31d   :  { %1945 = vmatpush3.xpose.msra.mxu0 %v2658_v9  ;;  %v2840_v9 = vld [vmem:[%s3593_s7 + $0x50] sm:$0xff] }
 0x31e   :  { %1981 = vmatprep.subr.mxu0 %v2806_v30 }
 0x320   :  { %1947 = vmatmul.mubr.f32.vlgmr.msra.gmra.mxu0 %v2537_v38  ;;  %v2826_v38 = vld [vmem:[%s3593_s7 + $0x60] sm:$0xff] }
 0x321   :  { %1982 = vmatpush3.msra.mxu0 %v2806_v30 }
 0x322   :  { %1983 = vmatprep.subr.mxu0 %v2811_v15 }
 0x323   :  { %1984 = vmatpush3.msra.mxu0 %v2811_v15 }
 0x324   :  { %1985 = vmatprep.subr.mxu0 %v2819_v19 }
 0x325   :  { %1986 = vmatpush3.msra.mxu0 %v2819_v19 }
 0x326   :  { %1987 = vmatprep.subr.mxu0 %v2826_v38 }
 0x327   :  { %1988 = vmatpush3.msra.mxu0 %v2826_v38 }
 0x328   :  { %1989 = vmatprep.subr.mxu0 %v2833_v5 }
 0x329   :  { %1990 = vmatpush3.msra.mxu0 %v2833_v5 }
 0x32a   :  { %1991 = vmatprep.subr.mxu0 %v2840_v9 }
 0x32b   :  { %1992 = vmatpush3.msra.mxu0 %v2840_v9 }
 0x32c   :  { %1993 = vmatprep.subr.mxu0 %v2847_v28 }
 0x32d   :  { %1994 = vmatpush3.msra.mxu0 %v2847_v28 }
 0x32e   :  { %1995 = vmatprep.subr.mxu0 %v2854_v42 }
 0x32f   :  { %1996 = vmatpush3.msra.mxu0 %v2854_v42 }
 0x330   :  { %1997 = vmatprep.subr.mxu0 %v2861_v53 }
 0x331   :  { %1998 = vmatpush3.msra.mxu0 %v2861_v53 }
 0x332   :  { %1999 = vmatprep.subr.mxu0 %v2868_v27 }
 0x333   :  { %2000 = vmatpush3.msra.mxu0 %v2868_v27 }
 0x334   :  { %2001 = vmatprep.subr.mxu0 %v2875_v20 }
 0x335   :  { %2002 = vmatpush3.msra.mxu0 %v2875_v20 }
 0x350   :  { %v698_v8 = vpop.xlane.xlu1 %697 }
 0x354   :  { %v694_v10 = vpop.xlane.xlu1 %693 }
 0x358   :  { %v700_v46 = vpop.xlane.xlu1 %699 }
 0x35c   :  { %v696_v13 = vpop.xlane.xlu1 %695 }
 0x360   :  { %v706_v32 = vpop.xlane.xlu1 %705 }
 0x364   :  { %v702_v37 = vpop.xlane.xlu1 %701 }
 0x368   :  { %v708_v60 = vpop.xlane.xlu1 %707 }
 0x36c   :  { %v704_v58 = vpop.xlane.xlu1 %703 }
 0x370   :  { %v714_v59 = vpop.xlane.xlu1 %713 }
 0x374   :  { %v710_v62 = vpop.xlane.xlu1 %709 }
 0x378   :  { %v712_v49 = vpop.xlane.xlu1 %711 }
 0x37c   :  { %v722_v4 = vpop.xlane.xlu1 %721 }
 0x380   :  { %v718_v51 = vpop.xlane.xlu1 %717 }
 0x3e0   :  { %v673_v2 = vpop.f32.mrf.mxu0 }
 0x3e1   :  { %v728_v12 = vrot.slane %v673_v2, %v419_v50  ;;  %v716_v50 = vpop.xlane.xlu0 %715 }
 0x3e2   :  { %v1948_v3 = vpop.f32.mrf.mxu0 }
 0x3e3   :  { %v729_v44 = vadd.f32 %v728_v12, %v694_v10  ;;  %v730_v31 = vadd.f32 %v728_v12, %v696_v13  ;;  %v731_v57 = vadd.f32 %v728_v12, %v698_v8  ;;  %v732_v45 = vadd.f32 %v728_v12, %v700_v46  ;;  %v720_v46 = vpop.xlane.xlu1 %719 }
 0x3e4   :  { %v733_v22 = vadd.f32 %v728_v12, %v702_v37  ;;  %v734_v16 = vadd.f32 %v728_v12, %v704_v58  ;;  %v735_v17 = vadd.f32 %v728_v12, %v706_v32  ;;  %v736_v41 = vadd.f32 %v728_v12, %v708_v60 }
 0x3e5   :  { %2106 = vtanh.f32 %v729_v44  ;;  %v737_v52 = vadd.f32 %v728_v12, %v710_v62  ;;  %v738_v48 = vadd.f32 %v728_v12, %v712_v49  ;;  %v739_v8 = vadd.f32 %v728_v12, %v714_v59 }
 0x3e6   :  { %2108 = vtanh.f32 %v730_v31  ;;  %v740_v10 = vadd.f32 %v728_v12, %v716_v50  ;;  %v741_v13 = vadd.f32 %v728_v12, %v718_v51  ;;  %v742_v37 = vadd.f32 %v728_v12, %v720_v46 }
 0x3e7   :  { %2110 = vtanh.f32 %v731_v57  ;;  %v724_v62 = vpop.xlane.xlu1 %723  ;;  %v743_v2 = vadd.f32 %v728_v12, %v722_v4 }
 0x3e8   :  { %2112 = vtanh.f32 %v732_v45 }
 0x3e9   :  { %2114 = vtanh.f32 %v733_v22 }
 0x3ea   :  { %2116 = vtanh.f32 %v734_v16 }
 0x3eb   :  { %2118 = vtanh.f32 %v735_v17 }
 0x3ec   :  { %2120 = vtanh.f32 %v736_v41 }
 0x3ed   :  { %2122 = vtanh.f32 %v737_v52 }
 0x3ee   :  { %2124 = vtanh.f32 %v738_v48 }
 0x3ef   :  { %2126 = vtanh.f32 %v739_v8 }
 0x3f0   :  { %2128 = vtanh.f32 %v740_v10 }
 0x3f1   :  { %2130 = vtanh.f32 %v741_v13 }
 0x3f2   :  { %v2107_v58 = vpop.eup %2106  ;;  %2132 = vtanh.f32 %v742_v37 }
 0x3f3   :  { %v2109_v32 = vpop.eup %2108  ;;  %v761_v45 = vmul.f32 %v2107_v58, %v2549_v18  ;;  %2134 = vtanh.f32 %v743_v2 }
 0x3f4   :  { %v2111_v22 = vpop.eup %2110  ;;  %v762_v16 = vmul.f32 %v2109_v32, %v2554_v23  ;;  %v744_v23 = vadd.f32 %v728_v12, %v724_v62 }
 0x3f5   :  { %v2113_v17 = vpop.eup %2112  ;;  %v763_v52 = vmul.f32 %v2111_v22, %v2559_v25 }
 0x3f6   :  { %v2115_v41 = vpop.eup %2114  ;;  %v777_v60 = vpack.c.bf16 %v762_v16, %v761_v45  ;;  %v764_v59 = vmul.f32 %v2113_v17, %v2565_v29  ;;  %2136 = vtanh.f32 %v744_v23 }
 0x3f7   :  { %v2117_v51 = vpop.eup %2116  ;;  %v765_v49 = vmul.f32 %v2115_v41, %v2571_v35 }
 0x3f8   :  { %v2119_v3 = vpop.eup %2118  ;;  %1965 = vmatprep.mubr.bf16.mxu1 %v777_v60  ;;  %v778_v18 = vpack.c.bf16 %v764_v59, %v763_v52  ;;  %v766_v44 = vmul.f32 %v2117_v51, %v2577_v40 }
 0x3f9   :  { %v2121_v31 = vpop.eup %2120  ;;  %v767_v29 = vmul.f32 %v2119_v3, %v2585_v0 }
 0x3fa   :  { %v2123_v57 = vpop.eup %2122  ;;  %1966 = vmatmul.mubr.bf16.vlgmr.msra.gmra.mxu1 %v778_v18  ;;  %v779_v25 = vpack.c.bf16 %v766_v44, %v765_v49  ;;  %v768_v35 = vmul.f32 %v2121_v31, %v2590_v1 }
 0x3fb   :  { %v2125_v48 = vpop.eup %2124  ;;  %2053 = vmatpush3.msra.mxu1 %v2806_v30  ;;  %v769_v4 = vmul.f32 %v2123_v57, %v2595_v6 }
 0x3fc   :  { %1969 = vmatprep.mubr.bf16.mxu1 %v779_v25  ;;  %2038 = vmatprep.subr.mxu1 %v2811_v15  ;;  %v770_v40 = vmul.f32 %v2125_v48, %v2600_v55  ;;  %v2127_v12 = vpop.eup %2126  ;;  %v780_v50 = vpack.c.bf16 %v768_v35, %v767_v29  ;;  %v3649_v48 = vld [vmem:[#allocation6_spill] sm:$0xff] }
 0x3fd   :  { %2054 = vmatpush3.msra.mxu1 %v2811_v15  ;;  %v2129_v30 = vpop.eup %2128  ;;  %v771_v6 = vmul.f32 %v2127_v12, %v2609_v24 }
 0x3fe   :  { %2039 = vmatprep.subr.mxu1 %v2819_v19  ;;  %v2131_v0 = vpop.eup %2130  ;;  %v781_v1 = vpack.c.bf16 %v770_v40, %v769_v4  ;;  %v772_v55 = vmul.f32 %v2129_v30, %v2614_v26  ;;  %v3650_v40 = vld [vmem:[#allocation9_spill] sm:$0xff] }
 0x3ff   :  { %2055 = vmatpush3.msra.mxu1 %v2819_v19  ;;  %v2133_v8 = vpop.eup %2132  ;;  %v773_v15 = vmul.f32 %v2131_v0, %v2619_v33  ;;  %v3651_v0 = vld [vmem:[#allocation7_spill] sm:$0xff] }
 0x400   :  { %2040 = vmatprep.subr.mxu1 %v2826_v38  ;;  %v774_v19 = vmul.f32 %v2133_v8, %v2624_v34  ;;  %v782_v10 = vpack.c.bf16 %v772_v55, %v771_v6  ;;  %v3652_v8 = vld [vmem:[#allocation10_spill] sm:$0xff]  ;;  %v3653_v55 = vld [vmem:[#allocation8_spill] sm:$0xff] }
 0x401   :  { %2056 = vmatpush3.msra.mxu1 %v2826_v38  ;;  %v2135_v38 = vpop.eup %2134 }
 0x402   :  { %1970 = vmatmul.mubr.bf16.gmra.mxu1 %v780_v50  ;;  %2041 = vmatprep.subr.mxu1 %v2833_v5  ;;  %v783_v24 = vpack.c.bf16 %v774_v19, %v773_v15  ;;  %v775_v26 = vmul.f32 %v2135_v38, %v2633_v54  ;;  %v909_v54 = vld [vmem:[%s3593_s7 + $0x18] sm:$0xff] }
 0x403   :  { %1973 = vmatprep.mubr.bf16.mxu1 %v781_v1  ;;  %2057 = vmatpush3.msra.mxu1 %v2833_v5  ;;  %v2137_v5 = vpop.eup %2136 }
 0x404   :  { %2042 = vmatprep.subr.mxu1 %v2840_v9  ;;  %v776_v33 = vmul.f32 %v2137_v5, %v2638_v56  ;;  %v908_v56 = vld [vmem:[%s3593_s7 + $0x10] sm:$0xff]  ;;  %v1702_v5 = vld [vmem:[%s3594_s8] ss:$0 sm:$0xff]  ;;  %s2259_s8 = smov [#allocation3]  }
 0x405   :  { %2058 = vmatpush3.msra.mxu1 %v2840_v9  ;;  %v910_v9 = vld [vmem:[%s3593_s7 + $0x20] sm:$0xff]  ;;  %s1669_s27 = sshll.u32 %s2259_s8, 4  ;;  %s1670_s27 = int_to_ptr.vmem [resolvable:$true] %s1669_s27 }
 0x406   :  { %2043 = vmatprep.subr.mxu1 %v2847_v28  ;;  %v784_v34 = vpack.c.bf16 %v776_v33, %v775_v26  ;;  %2003 = vmatprep.subr.mxu0 %v910_v9  ;;  %s2234_s12 = scalar_lea.vmem %s1670_s27, 16  ;;  %s2238_s13 = scalar_lea.vmem %s1670_s27, 32 }
 0x407   :  { %2059 = vmatpush3.msra.mxu1 %v2847_v28  ;;  %2004 = vmatpush3.msra.mxu0 %v910_v9  ;;  %v907_v28 = vld [vmem:[%s3593_s7 + $0x8] sm:$0xff]  ;;  %p2235_p0 = scmp.ne.s32.totalorder %s1670_s27, %s2234_s12  ;;  %p2239_p1 = scmp.lt.s32.totalorder %s1670_s27, %s1670_s27 }
 0x408   :  { %2044 = vmatprep.subr.mxu1 %v2854_v42  ;;  %2005 = vmatprep.subr.mxu0 %v909_v54  ;;  %p2240_p2 = scmp.lt.s32.totalorder %s2238_s13, %s2234_s12 }
 0x409   :  { %2060 = vmatpush3.msra.mxu1 %v2854_v42  ;;  %2006 = vmatpush3.msra.mxu0 %v909_v54  ;;  %v906_v42 = vld [vmem:[%s3593_s7] sm:$0xff] }
 0x40a   :  { %1974 = vmatmul.mubr.bf16.gmra.mxu1 %v782_v10  ;;  %2045 = vmatprep.subr.mxu1 %v2861_v53  ;;  %p2241_p3 = por %p2240_p2, %p2239_p1 }
 0x40b   :  { %1977 = vmatprep.mubr.bf16.mxu1 %v783_v24  ;;  %2061 = vmatpush3.msra.mxu1 %v2861_v53 }
 0x40c   :  { %2046 = vmatprep.subr.mxu1 %v2868_v27  ;;  %2007 = vmatprep.subr.mxu0 %v908_v56  ;;  %p2242_p4 = pnand %p2241_p3, %p2235_p0 }
 0x40d   :  { %2062 = vmatpush3.msra.mxu1 %v2868_v27  ;;  %2008 = vmatpush3.msra.mxu0 %v908_v56 }
 0x40e   :  { %2047 = vmatprep.subr.mxu1 %v2875_v20  ;;  %2009 = vmatprep.subr.mxu0 %v907_v28 }
 0x40f   :  { %2063 = vmatpush3.msra.mxu1 %v2875_v20  ;;  %2010 = vmatpush3.msra.mxu0 %v907_v28 }
 0x410   :  { %2048 = vmatprep.subr.mxu1 %v910_v9  ;;  %2011 = vmatprep.subr.mxu0 %v906_v42 }
 0x411   :  { %2064 = vmatpush3.msra.mxu1 %v910_v9  ;;  %2012 = vmatpush3.msra.mxu0 %v906_v42 }
 0x412   :  { %1978 = vmatmul.mubr.bf16.gmra.mxu1 %v784_v34  ;;  %2049 = vmatprep.subr.mxu1 %v909_v54 }
 0x413   :  { %2065 = vmatpush3.msra.mxu1 %v909_v54 }
 0x414   :  { %2050 = vmatprep.subr.mxu1 %v908_v56 }
 0x415   :  { %2066 = vmatpush3.msra.mxu1 %v908_v56 }
 0x416   :  { %2051 = vmatprep.subr.mxu1 %v907_v28 }
 0x417   :  { %2067 = vmatpush3.msra.mxu1 %v907_v28 }
 0x418   :  { %2052 = vmatprep.subr.mxu1 %v906_v42 }
 0x419   :  { %2068 = vmatpush3.msra.mxu1 %v906_v42 }
 0x4ba   :  { %v1967_v53 = vpop.f32.mrf.mxu1 }
 0x4bb   :  { %v836_v37 = vadd.f32 %v1967_v53, %v2648_v63 }
 0x4bc   :  { %v827_v27 = vpop.f32.mrf.mxu1 }
 0x4bd   :  { %v828_v20 = vadd.f32 %v827_v27, %v2655_v7  ;;  %v892_v52 = vmax.f32 %v836_v37, 0.0 }
 0x4be   :  { %v1968_v46 = vpop.f32.mrf.mxu1 }
 0x4bf   :  { %v890_v13 = vmax.f32 %v828_v20, 0.0  ;;  %v839_v22 = vadd.f32 %v1968_v46, %v2664_v36 }
 0x4c0   :  { %v830_v58 = vpop.f32.mrf.mxu1 }
 0x4c1   :  { %v831_v32 = vadd.f32 %v830_v58, %v2673_v21  ;;  %2013 = vmatprep.mubr.f32.mxu0 %v890_v13  ;;  %v893_v51 = vmax.f32 %v839_v22, 0.0 }
 0x4c2   :  { %v1971_v45 = vpop.f32.mrf.mxu1 }
 0x4c3   :  { %v891_v16 = vmax.f32 %v831_v32, 0.0  ;;  %v852_v17 = vadd.f32 %v1971_v45, %v2682_v39 }
 0x4c4   :  { %v843_v41 = vpop.f32.mrf.mxu1 }
 0x4c5   :  { %v896_v60 = vmax.f32 %v852_v17, 0.0  ;;  %v844_v59 = vadd.f32 %v843_v41, %v2691_v47  ;;  %2014 = vmatmul.mubr.f32.vlgmr.msra.gmra.mxu0 %v891_v16 }
 0x4c6   :  { %v1972_v7 = vpop.f32.mrf.mxu1  ;;  %2016 = vmatprep.mubr.f32.mxu0 %v892_v52 }
 0x4c7   :  { %v894_v63 = vmax.f32 %v844_v59, 0.0  ;;  %v855_v62 = vadd.f32 %v1972_v7, %v2704_v61  ;;  %2022 = vmatprep.mubr.f32.mxu1 %v896_v60  ;;  %v3648_v61 = vld [vmem:[#allocation11_spill] sm:$0xff] }
 0x4c8   :  { %v846_v21 = vpop.f32.mrf.mxu1 }
 0x4c9   :  { %v897_v49 = vmax.f32 %v855_v62, 0.0  ;;  %v847_v36 = vadd.f32 %v846_v21, %v2715_v14  ;;  %2017 = vmatmul.mubr.f32.gmra.mxu0 %v893_v51 }
 0x4ca   :  { %v1975_v2 = vpop.f32.mrf.mxu1  ;;  %2019 = vmatprep.mubr.f32.mxu0 %v894_v63 }
 0x4cb   :  { %v895_v39 = vmax.f32 %v847_v36, 0.0  ;;  %2023 = vmatmul.mubr.f32.vlgmr.msra.gmra.mxu1 %v897_v49  ;;  %v868_v23 = vadd.f32 %v1975_v2, %v2732_v43  ;;  %v3659_v2 = vlaneseq }
 0x4cc   :  { %v859_v3 = vpop.f32.mrf.mxu1 }
 0x4cd   :  { %v860_v47 = vadd.f32 %v859_v3, %v2756_v11  ;;  %2020 = vmatmul.mubr.f32.gmra.mxu0 %v895_v39  ;;  %v900_v35 = vmax.f32 %v868_v23, 0.0  ;;  %v3003_v39 = vand.u32 127, %v3659_v2 }
 0x4ce   :  { %v1976_v18 = vpop.f32.mrf.mxu1 }
 0x4cf   :  { %v898_v44 = vmax.f32 %v860_v47, 0.0  ;;  %v871_v14 = vadd.f32 %v1976_v18, %v3649_v48  ;;  %3660 = vst [vmem:[#allocation8_spill] sm:$0xff] %v3003_v39 }
 0x4d0   :  { %v862_v31 = vpop.f32.mrf.mxu1 }
 0x4d1   :  { %v863_v57 = vadd.f32 %v862_v31, %v3648_v61  ;;  %2025 = vmatprep.mubr.f32.mxu1 %v898_v44  ;;  %v901_v11 = vmax.f32 %v871_v14, 0.0 }
 0x4d2   :  { %v1979_v25 = vpop.f32.mrf.mxu1 }
 0x4d3   :  { %v899_v29 = vmax.f32 %v863_v57, 0.0  ;;  %v884_v1 = vadd.f32 %v1979_v25, %v3651_v0 }
 0x4d4   :  { %v875_v4 = vpop.f32.mrf.mxu1 }
 0x4d5   :  { %v876_v12 = vadd.f32 %v875_v4, %v3650_v40  ;;  %2026 = vmatmul.mubr.f32.gmra.mxu1 %v899_v29  ;;  %v904_v38 = vmax.f32 %v884_v1, 0.0 }
 0x4d6   :  { %v1980_v30 = vpop.f32.mrf.mxu1  ;;  %2028 = vmatprep.mubr.f32.mxu1 %v900_v35 }
 0x4d7   :  { %v902_v50 = vmax.f32 %v876_v12, 0.0  ;;  %v887_v15 = vadd.f32 %v1980_v30, %v3653_v55 }
 0x4d8   :  { %v878_v43 = vpop.f32.mrf.mxu1 }
 0x4d9   :  { %v879_v6 = vadd.f32 %v878_v43, %v3652_v8  ;;  %2029 = vmatmul.mubr.f32.gmra.mxu1 %v901_v11  ;;  %v905_v10 = vmax.f32 %v887_v15, 0.0 }
 0x4da   :  { %2031 = vmatprep.mubr.f32.mxu1 %v902_v50 }
 0x4db   :  { %v903_v19 = vmax.f32 %v879_v6, 0.0 }
 0x4dd   :  { %2032 = vmatmul.mubr.f32.gmra.mxu1 %v903_v19 }
 0x4de   :  { %2034 = vmatprep.mubr.f32.mxu1 %v904_v38 }
 0x4e1   :  { %2035 = vmatmul.mubr.f32.gmra.mxu1 %v905_v10 }
 0x585   :  { %v2015_v24 = vpop.f32.mrf.mxu0 }
 0x586   :  { %v2954_v26 = vadd.f32 %v2015_v24, %v1702_v5 }
 0x587   :  { %v995_v33 = vpop.f32.mrf.mxu0 }
 0x588   :  { %1076 = vmax.xlane.f32.xlu1 %v2954_v26  ;;  %v2957_v9 = vadd.f32 %v1702_v5, %v995_v33 }
 0x589   :  { %v2018_v34 = vpop.f32.mrf.mxu0 }
 0x58a   :  { %v2965_v46 = vadd.f32 %v2018_v34, %v1702_v5 }
 0x58b   :  { %v1005_v54 = vpop.f32.mrf.mxu0  ;;  %v2024_v56 = vpop.f32.mrf.mxu1 }
 0x58c   :  { %1074 = vmax.xlane.f32.xlu1 %v2957_v9  ;;  %v2960_v42 = vadd.f32 %v1702_v5, %v1005_v54  ;;  %v2977_v16 = vadd.f32 %v2024_v56, %v1702_v5 }
 0x58d   :  { %v2021_v28 = vpop.f32.mrf.mxu0  ;;  %v1025_v20 = vpop.f32.mrf.mxu1 }
 0x58e   :  { %v2968_v13 = vadd.f32 %v1702_v5, %v1025_v20  ;;  %v2971_v58 = vadd.f32 %v2021_v28, %v1702_v5 }
 0x58f   :  { %v1015_v53 = vpop.f32.mrf.mxu0 }
 0x590   :  { %v2962_v27 = vadd.f32 %v1702_v5, %v1015_v53  ;;  %1078 = vmax.xlane.f32.xlu1 %v2960_v42 }
 0x592   :  { %1082 = vmax.xlane.f32.xlu0 %v2962_v27 }
 0x594   :  { %1080 = vmax.xlane.f32.xlu1 %v2965_v46 }
 0x595   :  { %v2027_v37 = vpop.f32.mrf.mxu1 }
 0x596   :  { %1086 = vmax.xlane.f32.xlu0 %v2968_v13  ;;  %v2983_v60 = vadd.f32 %v2027_v37, %v1702_v5 }
 0x597   :  { %v1035_v32 = vpop.f32.mrf.mxu1 }
 0x598   :  { %v2974_v45 = vadd.f32 %v1702_v5, %v1035_v32  ;;  %1084 = vmax.xlane.f32.xlu1 %v2971_v58 }
 0x599   :  { %v2030_v22 = vpop.f32.mrf.mxu1 }
 0x59a   :  { %1090 = vmax.xlane.f32.xlu0 %v2974_v45  ;;  %v2989_v63 = vadd.f32 %v2030_v22, %v1702_v5 }
 0x59b   :  { %v1045_v17 = vpop.f32.mrf.mxu1 }
 0x59c   :  { %v2980_v52 = vadd.f32 %v1702_v5, %v1045_v17  ;;  %1088 = vmax.xlane.f32.xlu1 %v2977_v16  ;;  %3655 = vst [vmem:[#allocation6_spill] sm:$0xff] %v2989_v63 }
 0x59d   :  { %v2033_v41 = vpop.f32.mrf.mxu1 }
 0x59e   :  { %1094 = vmax.xlane.f32.xlu0 %v2980_v52  ;;  %v2995_v49 = vadd.f32 %v2033_v41, %v1702_v5 }
 0x59f   :  { %v1055_v59 = vpop.f32.mrf.mxu1 }
 0x5a0   :  { %v2986_v7 = vadd.f32 %v1702_v5, %v1055_v59  ;;  %1092 = vmax.xlane.f32.xlu1 %v2983_v60  ;;  %3657 = vst [vmem:[#allocation7_spill] sm:$0xff] %v2995_v49 }
 0x5a1   :  { %v2036_v51 = vpop.f32.mrf.mxu1 }
 0x5a2   :  { %3654 = vst [vmem:[#allocation11_spill] sm:$0xff] %v2986_v7  ;;  %1098 = vmax.xlane.f32.xlu0 %v2986_v7  ;;  %v2999_v36 = vadd.f32 %v2036_v51, %v1702_v5 }
 0x5a3   :  { %v1065_v62 = vpop.f32.mrf.mxu1 }
 0x5a4   :  { %v2992_v21 = vadd.f32 %v1702_v5, %v1065_v62  ;;  %1096 = vmax.xlane.f32.xlu1 %v2989_v63  ;;  %3658 = vst [vmem:[#allocation10_spill] sm:$0xff] %v2999_v36 }
 0x5a6   :  { %3656 = vst [vmem:[#allocation9_spill] sm:$0xff] %v2992_v21  ;;  %1102 = vmax.xlane.f32.xlu0 %v2992_v21 }
 0x5a8   :  { %1100 = vmax.xlane.f32.xlu1 %v2995_v49 }
 0x5ac   :  { %1104 = vmax.xlane.f32.xlu1 %v2999_v36 }
 0x611   :  { %v3005_v3 = vpop.xlane.xlu1 %1076 }
 0x612   :  { %3661 = vst [vmem:[#allocation12_spill] sm:$0xff] %v3005_v3  ;;  %vm1301_vm2 = vcmp.eq.f32.partialorder %v2954_v26, %v3005_v3 }
 0x613   :  { %v3010_v47 = vsel %vm1301_vm2, %v3003_v39, 128 }
 0x614   :  { %v1347_v18 = vshra.s32 %v3010_v47, 16 }
 0x615   :  { %v3013_v44 = vpop.xlane.xlu1 %1074 }
 0x616   :  { %3662 = vst [vmem:[#allocation13_spill] sm:$0xff] %v3013_v44  ;;  %vm1300_vm3 = vcmp.eq.f32.partialorder %v2957_v9, %v3013_v44  ;;  %v3017_v23 = vcvt.s32.f32 %v1347_v18 }
 0x617   :  { %v3020_v31 = vsel %vm1300_vm3, %v3003_v39, 128 }
 0x618   :  { %1350 = vmin.xlane.f32.xlu1 %v3017_v23  ;;  %v1333_v61 = vshra.s32 %v3020_v31, 16 }
 0x619   :  { %v3024_v57 = vpop.xlane.xlu1 %1078 }
 0x61a   :  { %3663 = vst [vmem:[#allocation14_spill] sm:$0xff] %v3024_v57  ;;  %vm1302_vm4 = vcmp.eq.f32.partialorder %v2960_v42, %v3024_v57  ;;  %v3028_v25 = vcvt.s32.f32 %v1333_v61 }
 0x61b   :  { %v3030_v48 = vpop.xlane.xlu0 %1082  ;;  %v3033_v14 = vsel %vm1302_vm4, %v3003_v39, 128 }
 0x61c   :  { %3664 = vst [vmem:[#allocation15_spill] sm:$0xff] %v3030_v48  ;;  %vm1304_vm5 = vcmp.eq.f32.partialorder %v2962_v27, %v3030_v48  ;;  %1336 = vmin.xlane.f32.xlu0 %v3028_v25  ;;  %v1361_v29 = vshra.s32 %v3033_v14, 16 }
 0x61d   :  { %v3039_v35 = vpop.xlane.xlu1 %1080  ;;  %v3042_v4 = vsel %vm1304_vm5, %v3003_v39, 128 }
 0x61e   :  { %3665 = vst [vmem:[#allocation16_spill] sm:$0xff] %v3039_v35  ;;  %vm1303_vm6 = vcmp.eq.f32.partialorder %v2965_v46, %v3039_v35  ;;  %v3048_v12 = vcvt.s32.f32 %v1361_v29  ;;  %v1389_v30 = vshra.s32 %v3042_v4, 16 }
 0x61f   :  { %v3046_v40 = vpop.xlane.xlu0 %1086  ;;  %v3052_v11 = vsel %vm1303_vm6, %v3003_v39, 128 }
 0x620   :  { %3666 = vst [vmem:[#allocation17_spill] sm:$0xff] %v3046_v40  ;;  %vm1306_vm7 = vcmp.eq.f32.partialorder %v2968_v13, %v3046_v40  ;;  %1364 = vmin.xlane.f32.xlu0 %v3048_v12  ;;  %v1375_v0 = vshra.s32 %v3052_v11, 16  ;;  %v3067_v8 = vcvt.s32.f32 %v1389_v30 }
 0x621   :  { %v3057_v50 = vpop.xlane.xlu1 %1084  ;;  %v3061_v1 = vsel %vm1306_vm7, %v3003_v39, 128 }
 0x622   :  { %3667 = vst [vmem:[#allocation18_spill] sm:$0xff] %v3057_v50  ;;  %vm1305_vm8 = vcmp.eq.f32.partialorder %v2971_v58, %v3057_v50  ;;  %v3069_v6 = vcvt.s32.f32 %v1375_v0  ;;  %v1417_v55 = vshra.s32 %v3061_v1, 16 }
 0x623   :  { %v3065_v43 = vpop.xlane.xlu0 %1090  ;;  %v3073_v15 = vsel %vm1305_vm8, %v3003_v39, 128 }
 0x624   :  { %3668 = vst [vmem:[#allocation19_spill] sm:$0xff] %v3065_v43  ;;  %vm1308_vm9 = vcmp.eq.f32.partialorder %v2974_v45, %v3065_v43  ;;  %1392 = vmin.xlane.f32.xlu0 %v3067_v8  ;;  %1378 = vmin.xlane.f32.xlu1 %v3069_v6  ;;  %v1403_v38 = vshra.s32 %v3073_v15, 16  ;;  %v3089_v24 = vcvt.s32.f32 %v1417_v55 }
 0x625   :  { %v3079_v19 = vpop.xlane.xlu1 %1088  ;;  %v3083_v10 = vsel %vm1308_vm9, %v3003_v39, 128 }
 0x626   :  { %3669 = vst [vmem:[#allocation20_spill] sm:$0xff] %v3079_v19  ;;  %vm1307_vm10 = vcmp.eq.f32.partialorder %v2977_v16, %v3079_v19  ;;  %v3091_v33 = vcvt.s32.f32 %v1403_v38  ;;  %v1445_v34 = vshra.s32 %v3083_v10, 16 }
 0x627   :  { %v3087_v5 = vpop.xlane.xlu0 %1094  ;;  %v3095_v54 = vsel %vm1307_vm10, %v3003_v39, 128 }
 0x628   :  { %3670 = vst [vmem:[#allocation21_spill] sm:$0xff] %v3087_v5  ;;  %vm1310_vm11 = vcmp.eq.f32.partialorder %v2980_v52, %v3087_v5  ;;  %1420 = vmin.xlane.f32.xlu0 %v3089_v24  ;;  %1406 = vmin.xlane.f32.xlu1 %v3091_v33  ;;  %v1431_v28 = vshra.s32 %v3095_v54, 16  ;;  %v3111_v37 = vcvt.s32.f32 %v1445_v34 }
 0x629   :  { %v3101_v56 = vpop.xlane.xlu1 %1092  ;;  %v3105_v53 = vsel %vm1310_vm11, %v3003_v39, 128 }
 0x62a   :  { %3671 = vst [vmem:[#allocation22_spill] sm:$0xff] %v3101_v56  ;;  %vm1309_vm12 = vcmp.eq.f32.partialorder %v2983_v60, %v3101_v56  ;;  %v3113_v32 = vcvt.s32.f32 %v1431_v28  ;;  %v1473_v22 = vshra.s32 %v3105_v53, 16 }
 0x62b   :  { %v3109_v20 = vpop.xlane.xlu0 %1098  ;;  %v3117_v17 = vsel %vm1309_vm12, %v3003_v39, 128 }
 0x62c   :  { %3672 = vst [vmem:[#allocation23_spill] sm:$0xff] %v3109_v20  ;;  %vm1312_vm13 = vcmp.eq.f32.partialorder %v2986_v7, %v3109_v20  ;;  %1448 = vmin.xlane.f32.xlu0 %v3111_v37  ;;  %1434 = vmin.xlane.f32.xlu1 %v3113_v32  ;;  %v1459_v59 = vshra.s32 %v3117_v17, 16  ;;  %v3133_v2 = vcvt.s32.f32 %v1473_v22  ;;  %v1346_v7 = vand.u32 65535, %v3010_v47 }
 0x62d   :  { %v3123_v41 = vpop.xlane.xlu1 %1096  ;;  %v3127_v51 = vsel %vm1312_vm13, %v3003_v39, 128 }
 0x62e   :  { %3673 = vst [vmem:[#allocation24_spill] sm:$0xff] %v3123_v41  ;;  %vm1311_vm14 = vcmp.eq.f32.partialorder %v2989_v63, %v3123_v41  ;;  %v3135_v18 = vcvt.s32.f32 %v1459_v59  ;;  %v1501_v61 = vshra.s32 %v3127_v51, 16  ;;  %v1374_v41 = vand.u32 65535, %v3052_v11 }
 0x62f   :  { %v3131_v62 = vpop.xlane.xlu0 %1102  ;;  %v3139_v29 = vsel %vm1311_vm14, %v3003_v39, 128 }
 0x630   :  { %3674 = vst [vmem:[#allocation25_spill] sm:$0xff] %v3131_v62  ;;  %vm1314_vm15 = vcmp.eq.f32.partialorder %v2992_v21, %v3131_v62  ;;  %1476 = vmin.xlane.f32.xlu0 %v3133_v2  ;;  %1462 = vmin.xlane.f32.xlu1 %v3135_v18  ;;  %v1487_v0 = vshra.s32 %v3139_v29, 16  ;;  %v3153_v38 = vcvt.s32.f32 %v1501_v61 }
 0x631   :  { %v3145_v30 = vpop.xlane.xlu1 %1100  ;;  %v3149_v55 = vsel %vm1314_vm15, %v3003_v39, 128 }
 0x632   :  { %3675 = vst [vmem:[#allocation26_spill] sm:$0xff] %v3145_v30  ;;  %vm1313_vm0 = vcmp.eq.f32.partialorder %v2995_v49, %v3145_v30  ;;  %v3155_v34 = vcvt.s32.f32 %v1487_v0  ;;  %v1529_v28 = vshra.s32 %v3149_v55, 16 }
 0x633   :  { %v3159_v22 = vsel %vm1313_vm0, %v3003_v39, 128 }
 0x634   :  { %v1515_v59 = vshra.s32 %v3159_v22, 16  ;;  %1504 = vmin.xlane.f32.xlu0 %v3153_v38  ;;  %1490 = vmin.xlane.f32.xlu1 %v3155_v34  ;;  %v3170_v0 = vcvt.s32.f32 %v1529_v28  ;;  %v1332_v28 = vand.u32 65535, %v3020_v31  ;;  %v1388_v31 = vand.u32 65535, %v3042_v4 }
 0x635   :  { %v3164_v21 = vpop.xlane.xlu1 %1104 }
 0x636   :  { %3676 = vst [vmem:[#allocation27_spill] sm:$0xff] %v3164_v21  ;;  %vm1315_vm1 = vcmp.eq.f32.partialorder %v2999_v36, %v3164_v21  ;;  %v3168_v61 = vcvt.s32.f32 %v1515_v59  ;;  %v1348_v59 = vcvt.s32.f32 %v1346_v7 }
 0x637   :  { %v3173_v62 = vsel %vm1315_vm1, %v3003_v39, 128  ;;  %v1334_v39 = vcvt.s32.f32 %v1332_v28 }
 0x638   :  { %v1543_v49 = vshra.s32 %v3173_v62, 16  ;;  %1532 = vmin.xlane.f32.xlu0 %v3170_v0  ;;  %1518 = vmin.xlane.f32.xlu1 %v3168_v61 }
 0x63a   :  { %v3178_v30 = vcvt.s32.f32 %v1543_v49  ;;  %v1360_v49 = vand.u32 65535, %v3033_v14  ;;  %v1376_v14 = vcvt.s32.f32 %v1374_v41 }
 0x63c   :  { %1546 = vmin.xlane.f32.xlu1 %v3178_v30  ;;  %v1362_v7 = vcvt.s32.f32 %v1360_v49 }
 0x6a1   :  { %v3182_v36 = vpop.xlane.xlu1 %1350 }
 0x6a2   :  { %vm1352_vm2 = vcmp.eq.f32.partialorder %v3017_v23, %v3182_v36 }
 0x6a3   :  { %v1353_v21 = vsel %vm1352_vm2, %v1348_v59, inf }
 0x6a4   :  { %1354 = vmin.xlane.f32.xlu1 %v1353_v21 }
 0x6a5   :  { %v3187_v20 = vpop.xlane.xlu0 %1336 }
 0x6a6   :  { %vm1338_vm3 = vcmp.eq.f32.partialorder %v3028_v25, %v3187_v20  ;;  %v1390_v25 = vcvt.s32.f32 %v1388_v31  ;;  %v3224_v31 = vsub.f32 %v2954_v26, %v3005_v3 }
 0x6a7   :  { %v1339_v63 = vsel %vm1338_vm3, %v1334_v39, inf  ;;  %v1402_v39 = vand.u32 65535, %v3073_v15  ;;  %v1430_v15 = vand.u32 65535, %v3095_v54 }
 0x6a8   :  { %1340 = vmin.xlane.f32.xlu0 %v1339_v63  ;;  %v1416_v63 = vand.u32 65535, %v3061_v1  ;;  %v1444_v1 = vand.u32 65535, %v3083_v10 }
 0x6a9   :  { %v3192_v47 = vpop.xlane.xlu0 %1364  ;;  %v1404_v41 = vcvt.s32.f32 %v1402_v39  ;;  %v3243_v39 = vsub.f32 %v2962_v27, %v3030_v48 }
 0x6aa   :  { %vm1366_vm4 = vcmp.eq.f32.partialorder %v3048_v12, %v3192_v47  ;;  %v1418_v49 = vcvt.s32.f32 %v1416_v63  ;;  %v3235_v63 = vsub.f32 %v2960_v42, %v3024_v57  ;;  %v3682_v57 = vld [vmem:[#allocation8_spill] sm:$0xff]  ;;  %v1371_v3 = vcvt.f32.s32 %v3192_v47 }
 0x6ab   :  { %v1367_v21 = vsel %vm1366_vm4, %v1362_v7, inf }
 0x6ac   :  { %1368 = vmin.xlane.f32.xlu0 %v1367_v21  ;;  %v1446_v21 = vcvt.s32.f32 %v1444_v1  ;;  %v1500_v1 = vand.u32 65535, %v3127_v51  ;;  %v3265_v51 = vsub.f32 %v2968_v13, %v3046_v40 }
 0x6ad   :  { %v3198_v23 = vpop.xlane.xlu0 %1392  ;;  %v3200_v59 = vpop.xlane.xlu1 %1378 }
 0x6ae   :  { %vm1394_vm5 = vcmp.eq.f32.partialorder %v3067_v8, %v3198_v23  ;;  %vm1380_vm6 = vcmp.eq.f32.partialorder %v3069_v6, %v3200_v59  ;;  %v3216_v8 = vsub.f32 %v2957_v9, %v3013_v44 }
 0x6af   :  { %v1395_v4 = vsel %vm1394_vm5, %v1390_v25, inf  ;;  %v1381_v12 = vsel %vm1380_vm6, %v1376_v14, inf  ;;  %v1432_v25 = vcvt.s32.f32 %v1430_v15  ;;  %v1472_v14 = vand.u32 65535, %v3105_v53 }
 0x6b0   :  { %1396 = vmin.xlane.f32.xlu0 %v1395_v4  ;;  %1382 = vmin.xlane.f32.xlu1 %v1381_v12  ;;  %v3248_v12 = vsub.f32 %v2965_v46, %v3039_v35  ;;  %v1486_v15 = vand.u32 65535, %v3139_v29 }
 0x6b1   :  { %v3208_v11 = vpop.xlane.xlu0 %1420  ;;  %v3210_v28 = vpop.xlane.xlu1 %1406 }
 0x6b2   :  { %vm1422_vm7 = vcmp.eq.f32.partialorder %v3089_v24, %v3208_v11  ;;  %vm1408_vm8 = vcmp.eq.f32.partialorder %v3091_v33, %v3210_v28  ;;  %v1458_v24 = vand.u32 65535, %v3117_v17  ;;  %v1122_v33 = vmul.f32 1.442695, %v3216_v8 }
 0x6b3   :  { %v1423_v6 = vsel %vm1422_vm7, %v1418_v49, inf  ;;  %v1409_v7 = vsel %vm1408_vm8, %v1404_v41, inf  ;;  %v1124_v17 = vmul.f32 1.442695, %v3224_v31  ;;  %v1474_v41 = vcvt.s32.f32 %v1472_v14 }
 0x6b4   :  { %1424 = vmin.xlane.f32.xlu0 %v1423_v6  ;;  %1410 = vmin.xlane.f32.xlu1 %v1409_v7  ;;  %2138 = vpow2.f32 %v1122_v33  ;;  %v1126_v6 = vmul.f32 1.442695, %v3235_v63  ;;  %v1130_v7 = vmul.f32 1.442695, %v3243_v39  ;;  %v1128_v14 = vmul.f32 1.442695, %v3248_v12 }
 0x6b5   :  { %v3226_v10 = vpop.xlane.xlu0 %1448  ;;  %v3228_v54 = vpop.xlane.xlu1 %1434  ;;  %2140 = vpow2.f32 %v1124_v17  ;;  %v1488_v33 = vcvt.s32.f32 %v1486_v15 }
 0x6b6   :  { %vm1450_vm9 = vcmp.eq.f32.partialorder %v3111_v37, %v3226_v10  ;;  %vm1436_vm10 = vcmp.eq.f32.partialorder %v3113_v32, %v3228_v54  ;;  %v1460_v32 = vcvt.s32.f32 %v1458_v24  ;;  %2142 = vpow2.f32 %v1126_v6 }
 0x6b7   :  { %v1451_v4 = vsel %vm1450_vm9, %v1446_v21, inf  ;;  %v1437_v53 = vsel %vm1436_vm10, %v1432_v25, inf  ;;  %2144 = vpow2.f32 %v1130_v7  ;;  %v3294_v7 = vsub.f32 %v2977_v16, %v3079_v19 }
 0x6b8   :  { %1452 = vmin.xlane.f32.xlu0 %v1451_v4  ;;  %1438 = vmin.xlane.f32.xlu1 %v1437_v53  ;;  %v1514_v4 = vand.u32 65535, %v3159_v22  ;;  %v3275_v53 = vsub.f32 %v2971_v58, %v3057_v50  ;;  %2146 = vpow2.f32 %v1128_v14 }
 0x6b9   :  { %v3250_v49 = vpop.xlane.xlu0 %1476  ;;  %v3252_v37 = vpop.xlane.xlu1 %1462 }
 0x6ba   :  { %vm1478_vm11 = vcmp.eq.f32.partialorder %v3133_v2, %v3250_v49  ;;  %vm1464_vm12 = vcmp.eq.f32.partialorder %v3135_v18, %v3252_v37  ;;  %v1502_v2 = vcvt.s32.f32 %v1500_v1  ;;  %v1528_v18 = vand.u32 65535, %v3149_v55 }
 0x6bb   :  { %v1479_v21 = vsel %vm1478_vm11, %v1474_v41, inf  ;;  %v1465_v25 = vsel %vm1464_vm12, %v1460_v32, inf  ;;  %v1134_v32 = vmul.f32 1.442695, %v3265_v51  ;;  %v3284_v55 = vsub.f32 %v2974_v45, %v3065_v43 }
 0x6bc   :  { %1480 = vmin.xlane.f32.xlu0 %v1479_v21  ;;  %1466 = vmin.xlane.f32.xlu1 %v1465_v25  ;;  %v1516_v15 = vcvt.s32.f32 %v1514_v4  ;;  %v1132_v6 = vmul.f32 1.442695, %v3275_v53  ;;  %v1343_v43 = vcvt.f32.s32 %v3187_v20 }
 0x6bd   :  { %v3267_v29 = vpop.xlane.xlu0 %1504  ;;  %v3269_v24 = vpop.xlane.xlu1 %1490  ;;  %2148 = vpow2.f32 %v1134_v32  ;;  %v1138_v14 = vmul.f32 1.442695, %v3284_v55 }
 0x6be   :  { %vm1506_vm13 = vcmp.eq.f32.partialorder %v3153_v38, %v3267_v29  ;;  %vm1492_vm14 = vcmp.eq.f32.partialorder %v3155_v34, %v3269_v24  ;;  %v1530_v38 = vcvt.s32.f32 %v1528_v18  ;;  %v1542_v34 = vand.u32 65535, %v3173_v62 }
 0x6bf   :  { %v1507_v17 = vsel %vm1506_vm13, %v1502_v2, inf  ;;  %v1493_v41 = vsel %vm1492_vm14, %v1488_v33, inf  ;;  %v3303_v62 = vsub.f32 %v2980_v52, %v3087_v5  ;;  %2150 = vpow2.f32 %v1132_v6 }
 0x6c0   :  { %1508 = vmin.xlane.f32.xlu0 %v1507_v17  ;;  %1494 = vmin.xlane.f32.xlu1 %v1493_v41  ;;  %v1544_v33 = vcvt.s32.f32 %v1542_v34  ;;  %2152 = vpow2.f32 %v1138_v14  ;;  %v1344_v48 = vshll.u32 %v1343_v43, 16 }
 0x6c1   :  { %v3286_v22 = vpop.xlane.xlu0 %1532  ;;  %v3288_v1 = vpop.xlane.xlu1 %1518  ;;  %v1142_v41 = vmul.f32 1.442695, %v3303_v62 }
 0x6c2   :  { %vm1534_vm15 = vcmp.eq.f32.partialorder %v3170_v0, %v3286_v22  ;;  %vm1520_vm0 = vcmp.eq.f32.partialorder %v3168_v61, %v3288_v1  ;;  %v1136_v0 = vmul.f32 1.442695, %v3294_v7  ;;  %v3310_v61 = vsub.f32 %v2983_v60, %v3101_v56  ;;  %v3314_v18 = vpop.eup %2138 }
 0x6c3   :  { %v1535_v21 = vsel %vm1534_vm15, %v1530_v38, inf  ;;  %v1521_v25 = vsel %vm1520_vm0, %v1516_v15, inf  ;;  %v3317_v17 = vpop.eup %2140  ;;  %v3678_v38 = vld [vmem:[#allocation24_spill] sm:$0xff]  ;;  %v3679_v15 = vld [vmem:[#allocation6_spill] sm:$0xff] }
 0x6c4   :  { %1536 = vmin.xlane.f32.xlu0 %v1535_v21  ;;  %1522 = vmin.xlane.f32.xlu1 %v1521_v25  ;;  %3677 = vst [vmem:[#allocation28_spill] sm:$0xff] %v3310_v61  ;;  %2154 = vpow2.f32 %v1136_v0  ;;  %v1140_v32 = vmul.f32 1.442695, %v3310_v61  ;;  %v3323_v34 = vsub.f32 %v3679_v15, %v3678_v38  ;;  %v3325_v6 = vpop.eup %2142  ;;  %v1357_v38 = vcvt.f32.s32 %v3182_v36  ;;  %v3683_v61 = vld [vmem:[#allocation23_spill] sm:$0xff] }
 0x6c5   :  { %v3305_v2 = vpop.xlane.xlu1 %1546  ;;  %2156 = vpow2.f32 %v1142_v41 }
 0x6c6   :  { %vm1548_vm1 = vcmp.eq.f32.partialorder %v3178_v30, %v3305_v2  ;;  %3680 = vst [vmem:[#allocation6_spill] sm:$0xff] %v3323_v34  ;;  %v3327_v30 = vpop.eup %2144  ;;  %2158 = vpow2.f32 %v1140_v32  ;;  %v1144_v25 = vmul.f32 1.442695, %v3323_v34  ;;  %v1358_v56 = vshll.u32 %v1357_v38, 16 }
 0x6c7   :  { %v1549_v4 = vsel %vm1548_vm1, %v1544_v33, inf  ;;  %v3331_v21 = vpop.eup %2146 }
 0x6c8   :  { %1154 = vadd.xlane.f32.xlu0 %v3314_v18  ;;  %1550 = vmin.xlane.f32.xlu1 %v1549_v4  ;;  %2160 = vpow2.f32 %v1144_v25 }
 0x6ca   :  { %v3336_v14 = vpop.eup %2148 }
 0x6cc   :  { %1158 = vadd.xlane.f32.xlu0 %v3325_v6  ;;  %1156 = vadd.xlane.f32.xlu1 %v3317_v17  ;;  %v3338_v33 = vpop.eup %2150 }
 0x6cd   :  { %v3342_v0 = vpop.eup %2152 }
 0x6d0   :  { %1162 = vadd.xlane.f32.xlu0 %v3327_v30  ;;  %1160 = vadd.xlane.f32.xlu1 %v3331_v21 }
 0x6d1   :  { %v3344_v4 = vpop.eup %2154 }
 0x6d2   :  { %v3348_v41 = vpop.eup %2156 }
 0x6d3   :  { %v3350_v32 = vpop.eup %2158 }
 0x6d4   :  { %1166 = vadd.xlane.f32.xlu0 %v3336_v14  ;;  %1164 = vadd.xlane.f32.xlu1 %v3338_v33 }
 0x6d5   :  { %v3354_v25 = vpop.eup %2160 }
 0x6d6   :  { %3681 = vst [vmem:[#allocation29_spill] sm:$0xff] %v3354_v25 }
 0x6d8   :  { %1170 = vadd.xlane.f32.xlu0 %v3342_v0  ;;  %1168 = vadd.xlane.f32.xlu1 %v3344_v4 }
 0x6dc   :  { %1174 = vadd.xlane.f32.xlu0 %v3348_v41  ;;  %1172 = vadd.xlane.f32.xlu1 %v3350_v32 }
 0x6e0   :  { %1176 = vadd.xlane.f32.xlu1 %v3354_v25  ;;  %v3684_v25 = vld [vmem:[#allocation11_spill] sm:$0xff] }
 0x6e1   :  { %v3364_v36 = vsub.f32 %v3684_v25, %v3683_v61 }
 0x6e3   :  { %3685 = vst [vmem:[#allocation8_spill] sm:$0xff] %v3364_v36 }
 0x72d   :  { %v1355_v5 = vpop.xlane.xlu1 %1354 }
 0x72e   :  { %v1356_v19 = vcvt.f32.s32 %v1355_v5  ;;  %v1372_v5 = vshll.u32 %v1371_v3, 16  ;;  %v1427_v3 = vcvt.f32.s32 %v3208_v11 }
 0x730   :  { %v1359_v40 = vadd.s32 %v1358_v56, %v1356_v19  ;;  %v1385_v19 = vcvt.f32.s32 %v3200_v59  ;;  %v1146_v56 = vmul.f32 1.442695, %v3364_v36 }
 0x731   :  { %v1341_v50 = vpop.xlane.xlu0 %1340 }
 0x732   :  { %v1342_v35 = vcvt.f32.s32 %v1341_v50  ;;  %vm1557_vm2 = vcmp.eq.s32.totalorder %v3682_v57, %v1359_v40  ;;  %v1386_v61 = vshll.u32 %v1385_v19, 16  ;;  %2162 = vpow2.f32 %v1146_v56 }
 0x733   :  { %v1573_v44 = vsel %vm1557_vm2, -inf, %v2954_v26  ;;  %v3686_v26 = vld [vmem:[#allocation26_spill] sm:$0xff]  ;;  %v1441_v19 = vcvt.f32.s32 %v3228_v54  ;;  %vm1659_vm2 = vcmask 0  }
 0x734   :  { %v1345_v34 = vadd.s32 %v1344_v48, %v1342_v35  ;;  %1590 = vmax.xlane.f32.xlu1 %v1573_v44  ;;  %v3687_v48 = vld [vmem:[#allocation7_spill] sm:$0xff]  ;;  %v1399_v35 = vcvt.f32.s32 %v3198_v23 }
 0x735   :  { %v1369_v38 = vpop.xlane.xlu0 %1368  ;;  %v3372_v44 = vsub.f32 %v3687_v48, %v3686_v26  ;;  %v1428_v26 = vshll.u32 %v1427_v3, 16 }
 0x736   :  { %vm1556_vm3 = vcmp.eq.s32.totalorder %v3682_v57, %v1345_v34  ;;  %v1370_v43 = vcvt.f32.s32 %v1369_v38 }
 0x737   :  { %v1572_v50 = vsel %vm1556_vm3, -inf, %v2957_v9 }
 0x738   :  { %1588 = vmax.xlane.f32.xlu0 %v1572_v50  ;;  %v1373_v40 = vadd.s32 %v1372_v5, %v1370_v43  ;;  %v1148_v5 = vmul.f32 1.442695, %v3372_v44  ;;  %v1400_v43 = vshll.u32 %v1399_v35, 16  ;;  %v1413_v50 = vcvt.f32.s32 %v3210_v28 }
 0x739   :  { %v1397_v20 = vpop.xlane.xlu0 %1396  ;;  %v1383_v47 = vpop.xlane.xlu1 %1382  ;;  %v1455_v28 = vcvt.f32.s32 %v3226_v10 }
 0x73a   :  { %v1384_v34 = vcvt.f32.s32 %v1383_v47  ;;  %vm1558_vm4 = vcmp.eq.s32.totalorder %v3682_v57, %v1373_v40  ;;  %v1398_v59 = vcvt.f32.s32 %v1397_v20  ;;  %2164 = vpow2.f32 %v1148_v5 }
 0x73b   :  { %v1574_v9 = vsel %vm1558_vm4, -inf, %v2960_v42  ;;  %v1414_v56 = vshll.u32 %v1413_v50, 16  ;;  %v1469_v5 = vcvt.f32.s32 %v3252_v37  ;;  %v1511_v37 = vcvt.f32.s32 %v3267_v29 }
 0x73c   :  { %v1387_v38 = vadd.s32 %v1386_v61, %v1384_v34  ;;  %1592 = vmax.xlane.f32.xlu0 %v1574_v9  ;;  %v1401_v42 = vadd.s32 %v1400_v43, %v1398_v59  ;;  %v1442_v34 = vshll.u32 %v1441_v19, 16  ;;  %v1456_v59 = vshll.u32 %v1455_v28, 16 }
 0x73d   :  { %v1425_v23 = vpop.xlane.xlu0 %1424  ;;  %v1411_v36 = vpop.xlane.xlu1 %1410 }
 0x73e   :  { %v1426_v11 = vcvt.f32.s32 %v1425_v23  ;;  %vm1559_vm5 = vcmp.eq.s32.totalorder %v3682_v57, %v1387_v38  ;;  %v1412_v61 = vcvt.f32.s32 %v1411_v36  ;;  %vm1560_vm7 = vcmp.eq.s32.totalorder %v3682_v57, %v1401_v42 }
 0x73f   :  { %v1575_v40 = vsel %vm1559_vm5, -inf, %v2965_v46  ;;  %v1483_v46 = vcvt.f32.s32 %v3250_v49  ;;  %v1576_v43 = vsel %vm1560_vm7, -inf, %v2962_v27  ;;  %v3689_v49 = vld [vmem:[#allocation9_spill] sm:$0xff]  ;;  %v1470_v27 = vshll.u32 %v1469_v5, 16 }
 0x740   :  { %v1429_v20 = vadd.s32 %v1428_v26, %v1426_v11  ;;  %1594 = vmax.xlane.f32.xlu1 %v1575_v40  ;;  %v1415_v3 = vadd.s32 %v1414_v56, %v1412_v61  ;;  %v3688_v11 = vld [vmem:[#allocation25_spill] sm:$0xff]  ;;  %v3398_v56 = vpop.eup %2162 }
 0x741   :  { %v1453_v47 = vpop.xlane.xlu0 %1452  ;;  %v1439_v35 = vpop.xlane.xlu1 %1438  ;;  %v3395_v40 = vsub.f32 %v3689_v49, %v3688_v11  ;;  %v1484_v42 = vshll.u32 %v1483_v46, 16 }
 0x742   :  { %v1440_v9 = vcvt.f32.s32 %v1439_v35  ;;  %vm1562_vm6 = vcmp.eq.s32.totalorder %v3682_v57, %v1429_v20  ;;  %v1454_v38 = vcvt.f32.s32 %v1453_v47  ;;  %vm1561_vm9 = vcmp.eq.s32.totalorder %v3682_v57, %v1415_v3  ;;  %v3691_v3 = vld [vmem:[#allocation10_spill] sm:$0xff] }
 0x743   :  { %v1578_v54 = vsel %vm1562_vm6, -inf, %v2968_v13  ;;  %v1577_v28 = vsel %vm1561_vm9, -inf, %v2971_v58  ;;  %v1150_v29 = vmul.f32 1.442695, %v3395_v40  ;;  %v1539_v58 = vcvt.f32.s32 %v3286_v22 }
 0x744   :  { %v1443_v23 = vadd.s32 %v1442_v34, %v1440_v9  ;;  %1600 = vmax.xlane.f32.xlu0 %v1578_v54  ;;  %v1457_v50 = vadd.s32 %v1456_v59, %v1454_v38  ;;  %v3690_v54 = vld [vmem:[#allocation27_spill] sm:$0xff]  ;;  %v1525_v59 = vcvt.f32.s32 %v3288_v1 }
 0x745   :  { %v1481_v36 = vpop.xlane.xlu0 %1480  ;;  %v1467_v26 = vpop.xlane.xlu1 %1466  ;;  %v3407_v38 = vsub.f32 %v3691_v3, %v3690_v54  ;;  %2166 = vpow2.f32 %v1150_v29 }
 0x746   :  { %vm1563_vm8 = vcmp.eq.s32.totalorder %v3682_v57, %v1443_v23  ;;  %v1482_v10 = vcvt.f32.s32 %v1481_v36  ;;  %v1468_v19 = vcvt.f32.s32 %v1467_v26  ;;  %vm1564_vm10 = vcmp.eq.s32.totalorder %v3682_v57, %v1457_v50 }
 0x747   :  { %v1579_v13 = vsel %vm1563_vm8, -inf, %v2977_v16  ;;  %v1497_v16 = vcvt.f32.s32 %v3269_v24  ;;  %v1512_v23 = vshll.u32 %v1511_v37, 16  ;;  %v3409_v36 = vpop.eup %2164  ;;  %v1540_v37 = vshll.u32 %v1539_v58, 16 }
 0x748   :  { %1596 = vmax.xlane.f32.xlu0 %v1576_v43  ;;  %1602 = vmax.xlane.f32.xlu1 %v1579_v13  ;;  %v1485_v47 = vadd.s32 %v1484_v42, %v1482_v10  ;;  %v1471_v34 = vadd.s32 %v1470_v27, %v1468_v19  ;;  %v1580_v10 = vsel %vm1564_vm10, -inf, %v2974_v45  ;;  %v1152_v19 = vmul.f32 1.442695, %v3407_v38 }
 0x749   :  { %v1509_v20 = vpop.xlane.xlu0 %1508  ;;  %v1495_v61 = vpop.xlane.xlu1 %1494  ;;  %v1498_v26 = vshll.u32 %v1497_v16, 16  ;;  %v1526_v1 = vshll.u32 %v1525_v59, 16 }
 0x74a   :  { %v1510_v35 = vcvt.f32.s32 %v1509_v20  ;;  %v1496_v9 = vcvt.f32.s32 %v1495_v61  ;;  %vm1566_vm11 = vcmp.eq.s32.totalorder %v3682_v57, %v1485_v47  ;;  %vm1565_vm12 = vcmp.eq.s32.totalorder %v3682_v57, %v1471_v34 }
 0x74b   :  { %v1553_v20 = vcvt.f32.s32 %v3305_v2  ;;  %v1582_v45 = vsel %vm1566_vm11, -inf, %v2980_v52  ;;  %v1581_v61 = vsel %vm1565_vm12, -inf, %v2983_v60 }
 0x74c   :  { %1178 = vadd.xlane.f32.xlu0 %v3398_v56  ;;  %1598 = vmax.xlane.f32.xlu1 %v1577_v28  ;;  %v1513_v5 = vadd.s32 %v1512_v23, %v1510_v35  ;;  %v1499_v43 = vadd.s32 %v1498_v26, %v1496_v9 }
 0x74d   :  { %v1537_v46 = vpop.xlane.xlu0 %1536  ;;  %v1523_v24 = vpop.xlane.xlu1 %1522  ;;  %v1554_v34 = vshll.u32 %v1553_v20, 16 }
 0x74e   :  { %v1538_v13 = vcvt.f32.s32 %v1537_v46  ;;  %v1524_v50 = vcvt.f32.s32 %v1523_v24  ;;  %vm1568_vm13 = vcmp.eq.s32.totalorder %v3682_v57, %v1513_v5  ;;  %vm1567_vm14 = vcmp.eq.s32.totalorder %v3682_v57, %v1499_v43 }
 0x74f   :  { %v1584_v47 = vsel %vm1568_vm13, -inf, %v3684_v25  ;;  %v1583_v52 = vsel %vm1567_vm14, -inf, %v3679_v15 }
 0x750   :  { %1604 = vmax.xlane.f32.xlu0 %v1580_v10  ;;  %1180 = vadd.xlane.f32.xlu1 %v3409_v36  ;;  %v1541_v27 = vadd.s32 %v1540_v37, %v1538_v13  ;;  %v1527_v16 = vadd.s32 %v1526_v1, %v1524_v50 }
 0x751   :  { %v1155_v42 = vpop.xlane.xlu0 %1154  ;;  %v1551_v22 = vpop.xlane.xlu1 %1550 }
 0x752   :  { %2168 = vrcp.f32 %v1155_v42  ;;  %v1552_v35 = vcvt.f32.s32 %v1551_v22  ;;  %vm1570_vm15 = vcmp.eq.s32.totalorder %v3682_v57, %v1541_v27  ;;  %vm1569_vm0 = vcmp.eq.s32.totalorder %v3682_v57, %v1527_v16  ;;  %v3432_v24 = vpop.eup %2166 }
 0x753   :  { %2170 = vlog2.f32 %v1155_v42  ;;  %v1586_v23 = vsel %vm1570_vm15, -inf, %v3689_v49  ;;  %v1585_v46 = vsel %vm1569_vm0, -inf, %v3687_v48 }
 0x754   :  { %1608 = vmax.xlane.f32.xlu0 %v1582_v45  ;;  %1606 = vmax.xlane.f32.xlu1 %v1581_v61  ;;  %2172 = vpow2.f32 %v1152_v19  ;;  %v1555_v60 = vadd.s32 %v1554_v34, %v1552_v35 }
 0x755   :  { %v1159_v28 = vpop.xlane.xlu0 %1158  ;;  %v1157_v2 = vpop.xlane.xlu1 %1156 }
 0x756   :  { %2174 = vrcp.f32 %v1159_v28  ;;  %vm1571_vm1 = vcmp.eq.s32.totalorder %v3682_v57, %v1555_v60 }
 0x757   :  { %2176 = vlog2.f32 %v1159_v28  ;;  %v1587_v58 = vsel %vm1571_vm1, -inf, %v3691_v3 }
 0x758   :  { %2178 = vrcp.f32 %v1157_v2  ;;  %1612 = vmax.xlane.f32.xlu0 %v1584_v47  ;;  %1610 = vmax.xlane.f32.xlu1 %v1583_v52 }
 0x759   :  { %2180 = vlog2.f32 %v1157_v2  ;;  %v1163_v9 = vpop.xlane.xlu0 %1162  ;;  %v1161_v29 = vpop.xlane.xlu1 %1160 }
 0x75a   :  { %2182 = vrcp.f32 %v1163_v9 }
 0x75b   :  { %2184 = vlog2.f32 %v1163_v9 }
 0x75c   :  { %2186 = vrcp.f32 %v1161_v29  ;;  %1616 = vmax.xlane.f32.xlu0 %v1586_v23  ;;  %1614 = vmax.xlane.f32.xlu1 %v1585_v46 }
 0x75d   :  { %2188 = vlog2.f32 %v1161_v29  ;;  %v1167_v15 = vpop.xlane.xlu0 %1166  ;;  %v1165_v25 = vpop.xlane.xlu1 %1164 }
 0x75e   :  { %2190 = vrcp.f32 %v1167_v15 }
 0x75f   :  { %v2169_v26 = vpop.eup %2168  ;;  %2192 = vlog2.f32 %v1167_v15 }
 0x760   :  { %v2171_v59 = vpop.eup %2170  ;;  %v1202_v49 = vmul.f32 %v2169_v26, %v3314_v18  ;;  %2194 = vrcp.f32 %v1165_v25  ;;  %1182 = vadd.xlane.f32.xlu0 %v3432_v24  ;;  %1618 = vmax.xlane.f32.xlu1 %v1587_v58 }
 0x761   :  { %v1235_v48 = vmul.f32 0.6931472, %v2171_v59  ;;  %2196 = vlog2.f32 %v1165_v25  ;;  %v1171_v57 = vpop.xlane.xlu0 %1170  ;;  %v1169_v5 = vpop.xlane.xlu1 %1168 }
 0x762   :  { %v3437_v10 = vpop.eup %2172  ;;  %1218 = vst [vmem:[%s3597_s11] sm:$0xff] %v1202_v49  ;;  %2198 = vrcp.f32 %v1171_v57 }
 0x763   :  { %v2175_v43 = vpop.eup %2174  ;;  %v1266_v3 = vsub.f32 %v3216_v8, %v1235_v48  ;;  %2200 = vlog2.f32 %v1171_v57 }
 0x764   :  { %v2177_v18 = vpop.eup %2176  ;;  %v1204_v13 = vmul.f32 %v2175_v43, %v3325_v6  ;;  %2202 = vrcp.f32 %v1169_v5  ;;  %1184 = vadd.xlane.f32.xlu1 %v3437_v10 }
 0x765   :  { %v2179_v50 = vpop.eup %2178  ;;  %1282 = vst [vmem:[%s3595_s9] sm:$0xff] %v1266_v3  ;;  %v1239_v19 = vmul.f32 0.6931472, %v2177_v18  ;;  %2204 = vlog2.f32 %v1169_v5  ;;  %v1175_v42 = vpop.xlane.xlu0 %1174 }
 0x766   :  { %v1173_v22 = vpop.xlane.xlu1 %1172  ;;  %v2181_v37 = vpop.eup %2180  ;;  %1220 = vst [vmem:[%s3597_s11 + $0x10] sm:$0xff] %v1204_v13  ;;  %v1203_v8 = vmul.f32 %v2179_v50, %v3317_v17  ;;  %2206 = vrcp.f32 %v1175_v42 }
 0x767   :  { %v2183_v6 = vpop.eup %2182  ;;  %v1268_v1 = vsub.f32 %v3235_v63, %v1239_v19  ;;  %v1237_v20 = vmul.f32 0.6931472, %v2181_v37  ;;  %2208 = vlog2.f32 %v1175_v42 }
 0x768   :  { %v2185_v45 = vpop.eup %2184  ;;  %1219 = vst [vmem:[%s3597_s11 + $0x8] sm:$0xff] %v1203_v8  ;;  %v1206_v61 = vmul.f32 %v2183_v6, %v3327_v30  ;;  %2210 = vrcp.f32 %v1173_v22  ;;  %v3695_v6 = vld [vmem:[#allocation13_spill] sm:$0xff] }
 0x769   :  { %v2187_v27 = vpop.eup %2186  ;;  %1284 = vst [vmem:[%s3595_s9 + $0x10] sm:$0xff] %v1268_v1  ;;  %v1267_v17 = vsub.f32 %v3224_v31, %v1237_v20  ;;  %v1243_v16 = vmul.f32 0.6931472, %v2185_v45  ;;  %2212 = vlog2.f32 %v1173_v22 }
 0x76a   :  { %v1177_v63 = vpop.xlane.xlu1 %1176  ;;  %v2189_v35 = vpop.eup %2188  ;;  %1222 = vst [vmem:[%s3597_s11 + $0x20] sm:$0xff] %v1206_v61  ;;  %v1205_v28 = vmul.f32 %v2187_v27, %v3331_v21  ;;  %v3696_v61 = vld [vmem:[#allocation12_spill] sm:$0xff] }
 0x76b   :  { %2214 = vrcp.f32 %v1177_v63  ;;  %v2191_v30 = vpop.eup %2190  ;;  %1283 = vst [vmem:[%s3595_s9 + $0x8] sm:$0xff] %v1267_v17  ;;  %v1270_v2 = vsub.f32 %v3243_v39, %v1243_v16  ;;  %v1241_v34 = vmul.f32 0.6931472, %v2189_v35  ;;  %v3697_v17 = vld [vmem:[#allocation14_spill] sm:$0xff]  ;;  %v3698_v35 = vld [vmem:[#allocation16_spill] sm:$0xff] }
 0x76c   :  { %2216 = vlog2.f32 %v1177_v63  ;;  %v2193_v31 = vpop.eup %2192  ;;  %1221 = vst [vmem:[%s3597_s11 + $0x18] sm:$0xff] %v1205_v28  ;;  %v1208_v47 = vmul.f32 %v2191_v30, %v3336_v14 }
 0x76d   :  { %v2195_v52 = vpop.eup %2194  ;;  %1286 = vst [vmem:[%s3595_s9 + $0x20] sm:$0xff] %v1270_v2  ;;  %v1269_v21 = vsub.f32 %v3248_v12, %v1241_v34  ;;  %v1247_v60 = vmul.f32 0.6931472, %v2193_v31  ;;  %v3699_v31 = vld [vmem:[#allocation15_spill] sm:$0xff] }
 0x76e   :  { %v2197_v9 = vpop.eup %2196  ;;  %1224 = vst [vmem:[%s3597_s11 + $0x30] sm:$0xff] %v1208_v47  ;;  %v1207_v39 = vmul.f32 %v2195_v52, %v3338_v33 }
 0x76f   :  { %v2199_v29 = vpop.eup %2198  ;;  %1285 = vst [vmem:[%s3595_s9 + $0x18] sm:$0xff] %v1269_v21  ;;  %v1272_v14 = vsub.f32 %v3265_v51, %v1247_v60  ;;  %v1245_v23 = vmul.f32 0.6931472, %v2197_v9 }
 0x770   :  { %v2201_v46 = vpop.eup %2200  ;;  %1223 = vst [vmem:[%s3597_s11 + $0x28] sm:$0xff] %v1207_v39  ;;  %v1210_v12 = vmul.f32 %v2199_v29, %v3342_v0  ;;  %v3700_v39 = vld [vmem:[#allocation18_spill] sm:$0xff] }
 0x771   :  { %v2203_v15 = vpop.eup %2202  ;;  %1288 = vst [vmem:[%s3595_s9 + $0x30] sm:$0xff] %v1272_v14  ;;  %v1271_v33 = vsub.f32 %v3275_v53, %v1245_v23  ;;  %v1251_v25 = vmul.f32 0.6931472, %v2201_v46  ;;  %v3701_v14 = vld [vmem:[#allocation17_spill] sm:$0xff] }
 0x772   :  { %v2205_v26 = vpop.eup %2204  ;;  %1226 = vst [vmem:[%s3597_s11 + $0x40] sm:$0xff] %v1210_v12  ;;  %v1209_v51 = vmul.f32 %v2203_v15, %v3344_v4 }
 0x773   :  { %v2207_v58 = vpop.eup %2206  ;;  %1287 = vst [vmem:[%s3595_s9 + $0x28] sm:$0xff] %v1271_v33  ;;  %v1274_v0 = vsub.f32 %v3284_v55, %v1251_v25  ;;  %v1249_v59 = vmul.f32 0.6931472, %v2205_v26  ;;  %v3702_v33 = vld [vmem:[#allocation20_spill] sm:$0xff] }
 0x774   :  { %v2209_v49 = vpop.eup %2208  ;;  %1225 = vst [vmem:[%s3597_s11 + $0x38] sm:$0xff] %v1209_v51  ;;  %v1212_v53 = vmul.f32 %v2207_v58, %v3348_v41  ;;  %v3703_v51 = vld [vmem:[#allocation19_spill] sm:$0xff] }
 0x775   :  { %v2211_v48 = vpop.eup %2210  ;;  %1290 = vst [vmem:[%s3595_s9 + $0x40] sm:$0xff] %v1274_v0  ;;  %v1273_v4 = vsub.f32 %v3294_v7, %v1249_v59  ;;  %v1255_v57 = vmul.f32 0.6931472, %v2209_v49  ;;  %v3692_v7 = vld [vmem:[#allocation29_spill] sm:$0xff] }
 0x776   :  { %v2213_v5 = vpop.eup %2212  ;;  %1228 = vst [vmem:[%s3597_s11 + $0x50] sm:$0xff] %v1212_v53  ;;  %v1211_v55 = vmul.f32 %v2211_v48, %v3350_v32  ;;  %v3693_v32 = vld [vmem:[#allocation28_spill] sm:$0xff]  ;;  %v3704_v48 = vld [vmem:[#allocation22_spill] sm:$0xff] }
 0x777   :  { %1289 = vst [vmem:[%s3595_s9 + $0x38] sm:$0xff] %v1273_v4  ;;  %v1276_v41 = vsub.f32 %v3303_v62, %v1255_v57  ;;  %v1253_v3 = vmul.f32 0.6931472, %v2213_v5  ;;  %v3694_v62 = vld [vmem:[#allocation6_spill] sm:$0xff]  ;;  %v3705_v57 = vld [vmem:[#allocation21_spill] sm:$0xff] }
 0x778   :  { %v2215_v43 = vpop.eup %2214  ;;  %1227 = vst [vmem:[%s3597_s11 + $0x48] sm:$0xff] %v1211_v55 }
 0x779   :  { %v2217_v18 = vpop.eup %2216  ;;  %v1213_v13 = vmul.f32 %v2215_v43, %v3692_v7  ;;  %1292 = vst [vmem:[%s3595_s9 + $0x50] sm:$0xff] %v1276_v41  ;;  %v1275_v50 = vsub.f32 %v3693_v32, %v1253_v3 }
 0x77a   :  { %v1257_v19 = vmul.f32 0.6931472, %v2217_v18  ;;  %v3706_v18 = vld [vmem:[#allocation24_spill] sm:$0xff] }
 0x77b   :  { %1229 = vst [vmem:[%s3597_s11 + $0x58] sm:$0xff] %v1213_v13  ;;  %1291 = vst [vmem:[%s3595_s9 + $0x48] sm:$0xff] %v1275_v50 }
 0x77c   :  { %v1277_v42 = vsub.f32 %v3694_v62, %v1257_v19  ;;  %v3707_v19 = vld [vmem:[#allocation23_spill] sm:$0xff] }
 0x77e   :  { %1293 = vst [vmem:[%s3595_s9 + $0x58] sm:$0xff] %v1277_v42 }
 0x7bd   :  { %v1591_v37 = vpop.xlane.xlu1 %1590 }
 0x7be   :  { %v1621_v27 = vsub.f32 %v1591_v37, %v3696_v61  ;;  %v3709_v61 = vld [vmem:[#allocation8_spill] sm:$0xff] }
 0x7c1   :  { %v1589_v22 = vpop.xlane.xlu0 %1588 }
 0x7c2   :  { %v1620_v1 = vsub.f32 %v1589_v22, %v3695_v6 }
 0x7c4   :  { %v1636_v63 = vadd.f32 %v1621_v27, %v1620_v1  ;;  %v3708_v1 = vld [vmem:[#allocation26_spill] sm:$0xff] }
 0x7c5   :  { %v1593_v8 = vpop.xlane.xlu0 %1592 }
 0x7c6   :  { %v1622_v16 = vsub.f32 %v1593_v8, %v3697_v17 }
 0x7c8   :  { %v1637_v34 = vadd.f32 %v1636_v63, %v1622_v16 }
 0x7c9   :  { %v1595_v20 = vpop.xlane.xlu1 %1594 }
 0x7ca   :  { %v1623_v28 = vsub.f32 %v1595_v20, %v3698_v35 }
 0x7cc   :  { %v1638_v52 = vadd.f32 %v1637_v34, %v1623_v28 }
 0x7cd   :  { %v1601_v45 = vpop.xlane.xlu0 %1600 }
 0x7ce   :  { %v1626_v23 = vsub.f32 %v1601_v45, %v3701_v14 }
 0x7d1   :  { %v1597_v30 = vpop.xlane.xlu0 %1596  ;;  %v1603_v2 = vpop.xlane.xlu1 %1602 }
 0x7d2   :  { %v1624_v47 = vsub.f32 %v1597_v30, %v3699_v31  ;;  %v1627_v25 = vsub.f32 %v1603_v2, %v3702_v33 }
 0x7d4   :  { %v1639_v9 = vadd.f32 %v1638_v52, %v1624_v47 }
 0x7d5   :  { %v1179_v21 = vpop.xlane.xlu0 %1178  ;;  %v1599_v60 = vpop.xlane.xlu1 %1598 }
 0x7d6   :  { %2218 = vrcp.f32 %v1179_v21  ;;  %v1625_v29 = vsub.f32 %v1599_v60, %v3700_v39 }
 0x7d7   :  { %2220 = vlog2.f32 %v1179_v21 }
 0x7d8   :  { %v1640_v46 = vadd.f32 %v1639_v9, %v1625_v29 }
 0x7d9   :  { %v1605_v12 = vpop.xlane.xlu0 %1604  ;;  %v1181_v15 = vpop.xlane.xlu1 %1180 }
 0x7da   :  { %v1641_v26 = vadd.f32 %v1640_v46, %v1626_v23  ;;  %2222 = vrcp.f32 %v1181_v15  ;;  %v1628_v58 = vsub.f32 %v1605_v12, %v3703_v51 }
 0x7db   :  { %2224 = vlog2.f32 %v1181_v15 }
 0x7dc   :  { %v1642_v0 = vadd.f32 %v1641_v26, %v1627_v25 }
 0x7dd   :  { %v1609_v59 = vpop.xlane.xlu0 %1608  ;;  %v1607_v49 = vpop.xlane.xlu1 %1606 }
 0x7de   :  { %v1643_v53 = vadd.f32 %v1642_v0, %v1628_v58  ;;  %v1629_v4 = vsub.f32 %v1607_v49, %v3704_v48  ;;  %v1630_v5 = vsub.f32 %v1609_v59, %v3705_v57 }
 0x7e0   :  { %v1644_v55 = vadd.f32 %v1643_v53, %v1629_v4 }
 0x7e1   :  { %v1613_v43 = vpop.xlane.xlu0 %1612  ;;  %v1611_v41 = vpop.xlane.xlu1 %1610 }
 0x7e2   :  { %v1645_v3 = vadd.f32 %v1644_v55, %v1630_v5  ;;  %v1631_v7 = vsub.f32 %v1611_v41, %v3706_v18  ;;  %v1632_v62 = vsub.f32 %v1613_v43, %v3707_v19 }
 0x7e3   :  { %v2219_v13 = vpop.eup %2218 }
 0x7e4   :  { %v2221_v32 = vpop.eup %2220  ;;  %v1214_v50 = vmul.f32 %v2219_v13, %v3398_v56  ;;  %v1646_v42 = vadd.f32 %v1645_v3, %v1631_v7 }
 0x7e5   :  { %v1259_v22 = vmul.f32 0.6931472, %v2221_v32  ;;  %v1617_v37 = vpop.xlane.xlu0 %1616  ;;  %v1615_v8 = vpop.xlane.xlu1 %1614 }
 0x7e6   :  { %1230 = vst [vmem:[%s3597_s11 + $0x60] sm:$0xff] %v1214_v50  ;;  %v1647_v6 = vadd.f32 %v1646_v42, %v1632_v62  ;;  %v1633_v20 = vsub.f32 %v1615_v8, %v3708_v1  ;;  %v1634_v56 = vsub.f32 %v1617_v37, %v3688_v11 }
 0x7e7   :  { %v2223_v45 = vpop.eup %2222  ;;  %v1278_v27 = vsub.f32 %v3709_v61, %v1259_v22 }
 0x7e8   :  { %v2225_v17 = vpop.eup %2224  ;;  %v1215_v16 = vmul.f32 %v2223_v45, %v3409_v36  ;;  %v1648_v63 = vadd.f32 %v1647_v6, %v1633_v20 }
 0x7e9   :  { %1294 = vst [vmem:[%s3595_s9 + $0x60] sm:$0xff] %v1278_v27  ;;  %v1261_v35 = vmul.f32 0.6931472, %v2225_v17  ;;  %v1183_v28 = vpop.xlane.xlu0 %1182  ;;  %v1619_v30 = vpop.xlane.xlu1 %1618 }
 0x7ea   :  { %1231 = vst [vmem:[%s3597_s11 + $0x68] sm:$0xff] %v1215_v16  ;;  %2226 = vrcp.f32 %v1183_v28  ;;  %v1649_v2 = vadd.f32 %v1648_v63, %v1634_v56  ;;  %v1635_v34 = vsub.f32 %v1619_v30, %v3690_v54 }
 0x7eb   :  { %v1279_v36 = vsub.f32 %v3372_v44, %v1261_v35  ;;  %2228 = vlog2.f32 %v1183_v28 }
 0x7ec   :  { %v1650_v11 = vadd.f32 %v1649_v2, %v1635_v34 }
 0x7ed   :  { %1295 = vst [vmem:[%s3595_s9 + $0x68] sm:$0xff] %v1279_v36  ;;  %v1185_v31 = vpop.xlane.xlu1 %1184 }
 0x7ee   :  { %v1651_v47 = vrot.slane %v1650_v11, 4  ;;  %2230 = vrcp.f32 %v1185_v31 }
 0x7ef   :  { %2232 = vlog2.f32 %v1185_v31 }
 0x7f0   :  { %v1652_v52 = vadd.f32 %v1651_v47, %v1650_v11 }
 0x7f2   :  { %v1653_v21 = vrot.slane %v1652_v52, 2 }
 0x7f4   :  { %v1654_v60 = vadd.f32 %v1653_v21, %v1652_v52 }
 0x7f6   :  { %v1655_v9 = vrot.slane %v1654_v60, 1 }
 0x7f7   :  { %v2227_v39 = vpop.eup %2226 }
 0x7f8   :  { %v2229_v54 = vpop.eup %2228  ;;  %v1216_v44 = vmul.f32 %v2227_v39, %v3432_v24  ;;  %v1656_v29 = vadd.f32 %v1655_v9, %v1654_v60 }
 0x7f9   :  { %v1263_v14 = vmul.f32 0.6931472, %v2229_v54 }
 0x7fa   :  { %1232 = vst [vmem:[%s3597_s11 + $0x70] sm:$0xff] %v1216_v44  ;;  %v1658_v23 = vmul.f32 0.0078125, %v1656_v29 }
 0x7fb   :  { %v2231_v46 = vpop.eup %2230  ;;  %v1280_v12 = vsub.f32 %v3395_v40, %v1263_v14 }
 0x7fc   :  { %v2233_v15 = vpop.eup %2232  ;;  %v1217_v33 = vmul.f32 %v2231_v46, %v3437_v10  ;;  %1660 = vst.msk [vmem:[#allocation3] sm:$0x1] %vm1659_vm2, %v1658_v23 }
 0x7fd   :  { %1296 = vst [vmem:[%s3595_s9 + $0x70] sm:$0xff] %v1280_v12  ;;  %v1265_v24 = vmul.f32 0.6931472, %v2233_v15 }
 0x7fe   :  { %2245 = shalt.err (!%p2242_p4)
}
 0x7ff   :  { %1672 = dma.vmem_to_hbm [thread:$0]  %s1670_s27, 16, %s3596_s10, [#allocation4]   ;;  %1233 = vst [vmem:[%s3597_s11 + $0x78] sm:$0xff] %v1217_v33  ;;  %v1281_v40 = vsub.f32 %v3407_v38, %v1265_v24 }
 0x801   :  { %1297 = vst [vmem:[%s3595_s9 + $0x78] sm:$0xff] %v1281_v40 }
 0x802   :  { %2254 = dma.done.wait [#allocation4], 16  }
 0x803   :  { %2255 = vsyncadd [#allocation4], 4294967280 }
 0x804   :  { %1682 = vsyncpa [#allocation4], 1 }

</bundles_post_ra>
